<compile_context>
chip_gen: v7x
topology: tpu7x:2x2x1
jax: 0.10.0
libtpu: 0.0.40
codegen_flags: <defaults>
</compile_context>

<pallas_src>
import math
import functools

import jax
import jax.numpy as jnp
from jax import lax
from jax.experimental import pallas as pl
from jax.experimental.pallas import tpu as pltpu


_NEG_INF = -1e30  # large finite negative: robust mask fill (causal diagonal is never masked)


# ----------------------------- VMEM budgeting / tile selection -----------------------------

@functools.lru_cache(maxsize=None)
def _vmem_budget_bytes():
    """Per-kernel VMEM budget derived from the chip (v5e/v6e: 128 MiB, v7x: 64 MiB/TC).
    Leaves ~40% headroom for compiler temporaries; conservative 64 MiB fallback."""
    cap = 64 << 20
    try:
        cap = int(getattr(pltpu.get_tpu_info(), "vmem_capacity_bytes", cap))
    except Exception:
        pass
    return min(int(cap * 0.62), 100 << 20)


def _largest_divisor_tile(total, target, aligns):
    """Largest tile <= target that divides `total` and is a multiple of one of `aligns`
    (tried in order), or the full extent when total <= target."""
    if total <= target:
        return total
    for align in aligns:
        t = (target // align) * align
        while t >= align:
            if total % t == 0:
                return t
            t -= align
    # TODO(synk): pad + pl.cdiv grid with a masked tail for non-friendly extents.
    return total


def _linear_tiles(R, D_in, D_out, in_bytes, out_bytes, budget):
    # 512-wide tiles; 256-multiples preferred (v6e/v7x MXU is 2x256x256, v5e is fine at 128).
    R_blk = _largest_divisor_tile(R, 512, (256, 128, 8))
    C_blk = _largest_divisor_tile(D_out, 512, (256, 128))

    def footprint(r, c):
        return (2 * r * D_in * in_bytes        # x blocks (double buffered)
                + 2 * D_in * c * 2             # bf16 weight column tiles
                + 2 * c * 4                    # bias tile
                + 2 * r * c * out_bytes        # output blocks
                + r * D_in * 2 + r * c * 4     # in-kernel bf16 copy + f32 accumulator
                + (1 << 20))

    while footprint(R_blk, C_blk) > budget:
        if (C_blk >= 256 and C_blk % 2 == 0 and (C_blk // 2) % 128 == 0
                and D_out % (C_blk // 2) == 0):
            C_blk //= 2
        elif (R_blk > 8 and R_blk % 2 == 0 and (R_blk // 2) % 8 == 0
                and R % (R_blk // 2) == 0):
            R_blk //= 2
        else:
            break

    # v7x has 2 TensorCores: give the "parallel" grid >= 2 steps when possible.
    if (R // R_blk) * (D_out // C_blk) < 2:
        for cand in range(R_blk // 2, 7, -1):
            if R % cand == 0 and cand % 8 == 0:
                R_blk = cand
                break
    return R_blk, C_blk


def _attention_tiles(NH, T, dh, budget):
    tq = _largest_divisor_tile(T, 256, (256, 128, 8))
    tk = _largest_divisor_tile(T, 512, (256, 128, 8))

    BH_blk = 1
    for cand in range(min(NH, 8), 0, -1):          # batch several (seq, head) per grid step
        if NH % cand == 0:
            BH_blk = cand
            break

    def footprint(bh, q, k):
        return (2 * bh * q * dh * 2 * 2            # q + o blocks (bf16, double buffered)
                + 2 * bh * k * dh * 2 * 2          # k + v blocks
                + bh * q * (dh + 2) * 4            # m / l / acc scratch
                + 3 * bh * q * k * 4               # live f32 score temporaries
                + (1 << 20))

    while footprint(BH_blk, tq, tk) > budget:
        if BH_blk > 1:
            BH_blk = max(d for d in range(1, BH_blk) if NH % d == 0)
        elif tk > 8 and tk % 2 == 0 and T % (tk // 2) == 0 and (tk // 2) % 8 == 0:
            tk //= 2
        elif tq > 8 and tq % 2 == 0 and T % (tq // 2) == 0 and (tq // 2) % 8 == 0:
            tq //= 2
        else:
            break

    # v7x has 2 TensorCores: give the "parallel" part of the grid >= 2 steps when possible.
    if (NH // BH_blk) * (T // tq) < 2 and BH_blk > 1:
        for cand in range(BH_blk // 2, 0, -1):
            if NH % cand == 0:
                BH_blk = cand
                break
    return BH_blk, tq, tk


# ----------------------------- kernels -----------------------------

def _linear_kernel(x_ref, w_ref, b_ref, y_ref):
    # y = x @ w + b : bf16 MXU operands, f32 accumulation, f32 bias add.
    x = x_ref[...].astype(jnp.bfloat16)
    y = jnp.dot(x, w_ref[...], preferred_element_type=jnp.float32)
    y_ref[...] = (y + b_ref[...]).astype(y_ref.dtype)


def _flash_kernel(q_ref, k_ref, v_ref, o_ref, m_sc, l_sc, acc_sc, *, scale, tq, tk):
    # Head-batched causal flash attention. q/k/v blocks: (BH_blk, tq|tk, dh) bf16.
    qi = pl.program_id(1)
    ki = pl.program_id(2)

    @pl.when(ki == 0)
    def _():
        m_sc[...] = jnp.full(m_sc.shape, -jnp.inf, m_sc.dtype)
        l_sc[...] = jnp.zeros(l_sc.shape, l_sc.dtype)
        acc_sc[...] = jnp.zeros(acc_sc.shape, acc_sc.dtype)

    # Skip kv tiles that are entirely above the causal diagonal.
    @pl.when(ki * tk <= qi * tq + (tq - 1))
    def _():
        # Fold the softmax scale into q (O(BH*tq*dh) instead of O(BH*tq*tk)).
        q = (q_ref[...].astype(jnp.float32) * scale).astype(jnp.bfloat16)
        s = jnp.einsum("bqd,bkd->bqk", q, k_ref[...],
                       preferred_element_type=jnp.float32)          # (BH, tq, tk) f32

        # 2-D causal mask, broadcast over the leading batch-head dim.
        rows = qi * tq + lax.broadcasted_iota(jnp.int32, (tq, tk), 0)
        cols = ki * tk + lax.broadcasted_iota(jnp.int32, (tq, tk), 1)
        s = jnp.where((cols <= rows)[None, :, :], s, _NEG_INF)

        m_prev = m_sc[...]
        m_new = jnp.maximum(m_prev, jnp.max(s, axis=-1, keepdims=True))
        alpha = jnp.exp(m_prev - m_new)
        p = jnp.exp(s - m_new)
        l_sc[...] = alpha * l_sc[...] + jnp.sum(p, axis=-1, keepdims=True)
        acc_sc[...] = alpha * acc_sc[...] + jnp.einsum(
            "bqk,bkd->bqd", p.astype(jnp.bfloat16), v_ref[...],
            preferred_element_type=jnp.float32)
        m_sc[...] = m_new

    # TODO(synk): attn_dropout / out_dropout are identity (eval / p=0.0).
    @pl.when(ki == pl.num_programs(2) - 1)
    def _():
        o_ref[...] = (acc_sc[...] *
                      pl.reciprocal(l_sc[...], approx=True)).astype(o_ref.dtype)


# ----------------------------- pallas_call wrappers -----------------------------

def _linear(x2d, w, b, *, out_dtype):
    # x2d: (R, D_in), w: (D_in, D_out) bf16, b: (1, D_out) f32  ->  (R, D_out) out_dtype
    R, D_in = x2d.shape
    D_out = w.shape[1]
    budget = _vmem_budget_bytes()
    R_blk, C_blk = _linear_tiles(R, D_in, D_out,
                                 jnp.dtype(x2d.dtype).itemsize,
                                 jnp.dtype(out_dtype).itemsize, budget)
    # TODO(synk): add a K grid axis + f32 VMEM accumulator (pl.when init/finalize) if D_in
    # grows large enough that a (D_in, C_blk) weight tile no longer fits the budget.
    return pl.pallas_call(
        _linear_kernel,
        out_shape=jax.ShapeDtypeStruct((R, D_out), out_dtype),
        grid=(R // R_blk, D_out // C_blk),
        in_specs=[
            pl.BlockSpec((R_blk, D_in), lambda i, j: (i, 0)),
            pl.BlockSpec((D_in, C_blk), lambda i, j: (0, j)),   # column-tiled weight
            pl.BlockSpec((1, C_blk), lambda i, j: (0, j)),
        ],
        out_specs=pl.BlockSpec((R_blk, C_blk), lambda i, j: (i, j)),
        compiler_params=pltpu.CompilerParams(
            dimension_semantics=("parallel", "parallel"),
            vmem_limit_bytes=budget,
        ),
    )(x2d, w, b)


def _flash_attention(q, k, v, scale):
    # q/k/v: (N*H, T, dh) bf16  ->  (N*H, T, dh) bf16
    NH, T, dh = q.shape
    budget = _vmem_budget_bytes()
    BH_blk, tq, tk = _attention_tiles(NH, T, dh, budget)

    q_spec = pl.BlockSpec((BH_blk, tq, dh), lambda b, qi, ki: (b, qi, 0))
    kv_spec = pl.BlockSpec((BH_blk, tk, dh), lambda b, qi, ki: (b, ki, 0))
    o_spec = pl.BlockSpec((BH_blk, tq, dh), lambda b, qi, ki: (b, qi, 0))

    return pl.pallas_call(
        functools.partial(_flash_kernel, scale=scale, tq=tq, tk=tk),
        out_shape=jax.ShapeDtypeStruct((NH, T, dh), jnp.bfloat16),
        grid=(NH // BH_blk, T // tq, T // tk),
        in_specs=[q_spec, kv_spec, kv_spec],
        out_specs=o_spec,
        scratch_shapes=[
            pltpu.VMEM((BH_blk, tq, 1), jnp.float32),    # running max  m
            pltpu.VMEM((BH_blk, tq, 1), jnp.float32),    # running sum  l
            pltpu.VMEM((BH_blk, tq, dh), jnp.float32),   # accumulator
        ],
        compiler_params=pltpu.CompilerParams(
            dimension_semantics=("parallel", "parallel", "arbitrary"),
            vmem_limit_bytes=budget,
        ),
    )(q, k, v)


# ----------------------------- module forward -----------------------------

def multihead_self_attention(x, params, *, n_heads):
    """Forward of MultiheadSelfAttention: causal MHA + output Linear (dropout = identity)."""
    N, T, D = x.shape
    H = n_heads
    dh = D // H
    scale = 1.0 / math.sqrt(dh)

    # fused q/k/v projection over all N*T rows; bf16 intermediate halves HBM traffic
    qkv = _linear(x.reshape(N * T, D), params["wqkv"], params["bqkv"],
                  out_dtype=jnp.bfloat16)                                  # (N*T, 3D) bf16

    # wrapper-side layout plumbing only (bf16): build head-batched (N*H, T, dh) views
    qkv = qkv.reshape(N, T, 3, H, dh).transpose(2, 0, 3, 1, 4)             # (3, N, H, T, dh)
    q = qkv[0].reshape(N * H, T, dh)
    k = qkv[1].reshape(N * H, T, dh)
    v = qkv[2].reshape(N * H, T, dh)

    ctx = _flash_attention(q, k, v, scale)                                 # (N*H, T, dh) bf16

    ctx = ctx.reshape(N, H, T, dh).transpose(0, 2, 1, 3).reshape(N * T, D)
    out = _linear(ctx, params["wo"], params["bo"], out_dtype=jnp.float32)  # (N*T, D) f32
    return out.reshape(N, T, D)


# ----------------------------- parameter init & reference -----------------------------

def init_params(key, D):
    # Weights stored pre-transposed to (in_features, out_features) and in bf16
    # (MXU operand dtype); biases stay f32.
    kq, kk, kv, ko, kb = jax.random.split(key, 5)
    std = 0.02
    wq = std * jax.random.normal(kq, (D, D), jnp.float32)
    wk = std * jax.random.normal(kk, (D, D), jnp.float32)
    wv = std * jax.random.normal(kv, (D, D), jnp.float32)
    wo = std * jax.random.normal(ko, (D, D), jnp.float32)
    bo = std * jax.random.normal(kb, (1, D), jnp.float32)
    return dict(
        wqkv=jnp.concatenate([wq, wk, wv], axis=1).astype(jnp.bfloat16),   # (D, 3D) fused
        bqkv=jnp.zeros((1, 3 * D), jnp.float32),                           # q/k/v bias=False
        wo=wo.astype(jnp.bfloat16),
        bo=bo,
    )


def _reference_forward(x, params, n_heads):
    # Pure-JAX f32 reference (same bf16-rounded weights) for a sanity check.
    N, T, D = x.shape
    H = n_heads
    dh = D // H
    qkv = x.reshape(N * T, D) @ params["wqkv"].astype(jnp.float32) + params["bqkv"]
    qkv = qkv.reshape(N, T, 3, H, dh).transpose(2, 0, 3, 1, 4)
    q, k, v = qkv[0], qkv[1], qkv[2]                                       # (N, H, T, dh)
    s = jnp.einsum("nhqd,nhkd->nhqk", q, k) / math.sqrt(dh)
    mask = jnp.tril(jnp.ones((T, T), bool))
    s = jnp.where(mask, s, -jnp.inf)
    p = jax.nn.softmax(s, axis=-1)
    ctx = jnp.einsum("nhqk,nhkd->nhqd", p, v)
    ctx = ctx.transpose(0, 2, 1, 3).reshape(N * T, D)
    out = ctx @ params["wo"].astype(jnp.float32) + params["bo"]
    return out.reshape(N, T, D)


# ----------------------------- main -----------------------------

if __name__ == "__main__":
    # toy GPTConfig-consistent shapes: embedding_size=64, n_heads=4; batch=2, seq=16
    N, T, D, HEADS = 2, 16, 64, 4

    root = jax.random.PRNGKey(0)
    k_x, k_p = jax.random.split(root)
    x = jax.random.normal(k_x, (N, T, D), jnp.float32)
    params = init_params(k_p, D)

    fwd = jax.jit(functools.partial(multihead_self_attention, n_heads=HEADS))
    out = jax.block_until_ready(fwd(x, params))

    assert out.shape == (N, T, D)
    assert bool(jnp.all(jnp.isfinite(out)))

    ref = _reference_forward(x, params, HEADS)
    assert float(jnp.max(jnp.abs(out - ref))) < 5e-2  # bf16 activations + approx reciprocal

    print("KERNEL_OK")
</pallas_src>

<mosaic_0001>
module attributes {stable_mosaic.version = 11 : i64} {
  func.func @_linear_kernel(%arg0: i32, %arg1: i32, %arg2: memref<16x64xf32, #tpu.memory_space<vmem>>, %arg3: memref<64x192xbf16, #tpu.memory_space<vmem>>, %arg4: memref<1x192xf32, #tpu.memory_space<vmem>>, %arg5: memref<16x192xbf16, #tpu.memory_space<vmem>>) attributes {dimension_semantics = [#tpu.dimension_semantics<parallel>, #tpu.dimension_semantics<parallel>], iteration_bounds = array<i64: 2, 1>, scalar_prefetch = 0 : i64, scratch_operands = 0 : i64, tpu.core_type = #tpu.core_type<tc>, window_params = [{transform_indices = @transform_0, window_bounds = array<i64: 16, 64>}, {transform_indices = @transform_1, window_bounds = array<i64: 64, 192>}, {transform_indices = @transform_2, window_bounds = array<i64: 1, 192>}, {transform_indices = @transform_3, window_bounds = array<i64: 16, 192>}]} {
    %c0 = arith.constant 0 : index
    %c0_0 = arith.constant 0 : index
    %0 = vector.load %arg2[%c0, %c0_0] : memref<16x64xf32, #tpu.memory_space<vmem>>, vector<16x64xf32>
    %1 = arith.truncf %0 : vector<16x64xf32> to vector<16x64xbf16>
    %c0_1 = arith.constant 0 : index
    %c0_2 = arith.constant 0 : index
    %2 = vector.load %arg3[%c0_1, %c0_2] : memref<64x192xbf16, #tpu.memory_space<vmem>>, vector<64x192xbf16>
    %cst = arith.constant dense<0.000000e+00> : vector<16x192xf32>
    %3 = tpu.matmul %1, %2, %cst {dimension_numbers = #tpu.dot_dimension_numbers<[1], [0], [0], [1], [0, 0, 1, 1], [], []>} : vector<16x64xbf16>, vector<64x192xbf16>, vector<16x192xf32> -> vector<16x192xf32>
    %c0_3 = arith.constant 0 : index
    %c0_4 = arith.constant 0 : index
    %4 = vector.load %arg4[%c0_3, %c0_4] : memref<1x192xf32, #tpu.memory_space<vmem>>, vector<1x192xf32>
    %5 = vector.broadcast %4 : vector<1x192xf32> to vector<16x192xf32>
    %6 = arith.addf %3, %5 : vector<16x192xf32>
    %7 = arith.truncf %6 : vector<16x192xf32> to vector<16x192xbf16>
    %c0_5 = arith.constant 0 : index
    %c0_6 = arith.constant 0 : index
    %8 = vector.load %arg5[%c0_5, %c0_6] : memref<16x192xbf16, #tpu.memory_space<vmem>>, vector<16x192xbf16>
    tpu.vector_store %arg5[%c0_5, %c0_6], %7 {strides = array<i32>} : memref<16x192xbf16, #tpu.memory_space<vmem>>, vector<16x192xbf16>,
    return
  }
  func.func @transform_0(%arg0: i32, %arg1: i32) -> (i32, i32) {
    %c0_i32 = arith.constant 0 : i32
    %c0_i32_0 = arith.constant 0 : i32
    return %arg0, %c0_i32 : i32, i32
  }
  func.func @transform_1(%arg0: i32, %arg1: i32) -> (i32, i32) {
    %c0_i32 = arith.constant 0 : i32
    %c0_i32_0 = arith.constant 0 : i32
    return %c0_i32, %arg1 : i32, i32
  }
  func.func @transform_2(%arg0: i32, %arg1: i32) -> (i32, i32) {
    %c0_i32 = arith.constant 0 : i32
    %c0_i32_0 = arith.constant 0 : i32
    return %c0_i32, %arg1 : i32, i32
  }
  func.func @transform_3(%arg0: i32, %arg1: i32) -> (i32, i32) {
    %c0_i32 = arith.constant 0 : i32
    return %arg0, %arg1 : i32, i32
  }
}

module attributes {stable_mosaic.version = 11 : i64} {
  func.func @_linear_kernel(%arg0: i32, %arg1: i32, %arg2: memref<16x64xbf16, #tpu.memory_space<vmem>>, %arg3: memref<64x64xbf16, #tpu.memory_space<vmem>>, %arg4: memref<1x64xf32, #tpu.memory_space<vmem>>, %arg5: memref<16x64xf32, #tpu.memory_space<vmem>>) attributes {dimension_semantics = [#tpu.dimension_semantics<parallel>, #tpu.dimension_semantics<parallel>], iteration_bounds = array<i64: 2, 1>, scalar_prefetch = 0 : i64, scratch_operands = 0 : i64, tpu.core_type = #tpu.core_type<tc>, window_params = [{transform_indices = @transform_0, window_bounds = array<i64: 16, 64>}, {transform_indices = @transform_1, window_bounds = array<i64: 64, 64>}, {transform_indices = @transform_2, window_bounds = array<i64: 1, 64>}, {transform_indices = @transform_3, window_bounds = array<i64: 16, 64>}]} {
    %c0 = arith.constant 0 : index
    %c0_0 = arith.constant 0 : index
    %0 = vector.load %arg2[%c0, %c0_0] : memref<16x64xbf16, #tpu.memory_space<vmem>>, vector<16x64xbf16>
    %c0_1 = arith.constant 0 : index
    %c0_2 = arith.constant 0 : index
    %1 = vector.load %arg3[%c0_1, %c0_2] : memref<64x64xbf16, #tpu.memory_space<vmem>>, vector<64x64xbf16>
    %cst = arith.constant dense<0.000000e+00> : vector<16x64xf32>
    %2 = tpu.matmul %0, %1, %cst {dimension_numbers = #tpu.dot_dimension_numbers<[1], [0], [0], [1], [0, 0, 1, 1], [], []>} : vector<16x64xbf16>, vector<64x64xbf16>, vector<16x64xf32> -> vector<16x64xf32>
    %c0_3 = arith.constant 0 : index
    %c0_4 = arith.constant 0 : index
    %3 = vector.load %arg4[%c0_3, %c0_4] : memref<1x64xf32, #tpu.memory_space<vmem>>, vector<1x64xf32>
    %4 = vector.broadcast %3 : vector<1x64xf32> to vector<16x64xf32>
    %5 = arith.addf %2, %4 : vector<16x64xf32>
    %c0_5 = arith.constant 0 : index
    %c0_6 = arith.constant 0 : index
    %6 = vector.load %arg5[%c0_5, %c0_6] : memref<16x64xf32, #tpu.memory_space<vmem>>, vector<16x64xf32>
    tpu.vector_store %arg5[%c0_5, %c0_6], %5 {strides = array<i32>} : memref<16x64xf32, #tpu.memory_space<vmem>>, vector<16x64xf32>,
    return
  }
  func.func @transform_0(%arg0: i32, %arg1: i32) -> (i32, i32) {
    %c0_i32 = arith.constant 0 : i32
    %c0_i32_0 = arith.constant 0 : i32
    return %arg0, %c0_i32 : i32, i32
  }
  func.func @transform_1(%arg0: i32, %arg1: i32) -> (i32, i32) {
    %c0_i32 = arith.constant 0 : i32
    %c0_i32_0 = arith.constant 0 : i32
    return %c0_i32, %arg1 : i32, i32
  }
  func.func @transform_2(%arg0: i32, %arg1: i32) -> (i32, i32) {
    %c0_i32 = arith.constant 0 : i32
    %c0_i32_0 = arith.constant 0 : i32
    return %c0_i32, %arg1 : i32, i32
  }
  func.func @transform_3(%arg0: i32, %arg1: i32) -> (i32, i32) {
    %c0_i32 = arith.constant 0 : i32
    return %arg0, %arg1 : i32, i32
  }
}

module attributes {stable_mosaic.version = 11 : i64} {
  func.func @_flash_kernel(%arg0: i32, %arg1: i32, %arg2: i32, %arg3: memref<4x16x16xbf16, #tpu.memory_space<vmem>>, %arg4: memref<4x16x16xbf16, #tpu.memory_space<vmem>>, %arg5: memref<4x16x16xbf16, #tpu.memory_space<vmem>>, %arg6: memref<4x16x16xbf16, #tpu.memory_space<vmem>>, %arg7: memref<4x16x1xf32, #tpu.memory_space<vmem>>, %arg8: memref<4x16x1xf32, #tpu.memory_space<vmem>>, %arg9: memref<4x16x16xf32, #tpu.memory_space<vmem>>) attributes {dimension_semantics = [#tpu.dimension_semantics<parallel>, #tpu.dimension_semantics<parallel>, #tpu.dimension_semantics<arbitrary>], iteration_bounds = array<i64: 2, 1, 1>, scalar_prefetch = 0 : i64, scratch_operands = 3 : i64, tpu.core_type = #tpu.core_type<tc>, window_params = [{transform_indices = @transform_0, window_bounds = array<i64: 4, 16, 16>}, {transform_indices = @transform_1, window_bounds = array<i64: 4, 16, 16>}, {transform_indices = @transform_2, window_bounds = array<i64: 4, 16, 16>}, {transform_indices = @transform_3, window_bounds = array<i64: 4, 16, 16>}]} {
    %c0_i32 = arith.constant 0 : i32
    %0 = arith.cmpi eq, %arg2, %c0_i32 : i32
    %1 = arith.extui %0 : i1 to i32
    %c0_i32_0 = arith.constant 0 : i32
    %2 = arith.cmpi ne, %1, %c0_i32_0 : i32
    scf.if %2 {
      %cst = arith.constant 0xFF800000 : f32
      %12 = vector.broadcast %cst : f32 to vector<4x16x1xf32>
      %c0 = arith.constant 0 : index
      %c0_5 = arith.constant 0 : index
      %c0_6 = arith.constant 0 : index
      %13 = vector.load %arg7[%c0, %c0_5, %c0_6] : memref<4x16x1xf32, #tpu.memory_space<vmem>>, vector<4x16x1xf32>
      tpu.vector_store %arg7[%c0, %c0_5, %c0_6], %12 {strides = array<i32>} : memref<4x16x1xf32, #tpu.memory_space<vmem>>, vector<4x16x1xf32>,
      %cst_7 = arith.constant 0.000000e+00 : f32
      %14 = vector.broadcast %cst_7 : f32 to vector<4x16x1xf32>
      %c0_8 = arith.constant 0 : index
      %c0_9 = arith.constant 0 : index
      %c0_10 = arith.constant 0 : index
      %15 = vector.load %arg8[%c0_8, %c0_9, %c0_10] : memref<4x16x1xf32, #tpu.memory_space<vmem>>, vector<4x16x1xf32>
      tpu.vector_store %arg8[%c0_8, %c0_9, %c0_10], %14 {strides = array<i32>} : memref<4x16x1xf32, #tpu.memory_space<vmem>>, vector<4x16x1xf32>,
      %cst_11 = arith.constant 0.000000e+00 : f32
      %16 = vector.broadcast %cst_11 : f32 to vector<4x16x16xf32>
      %c0_12 = arith.constant 0 : index
      %c0_13 = arith.constant 0 : index
      %c0_14 = arith.constant 0 : index
      %17 = vector.load %arg9[%c0_12, %c0_13, %c0_14] : memref<4x16x16xf32, #tpu.memory_space<vmem>>, vector<4x16x16xf32>
      tpu.vector_store %arg9[%c0_12, %c0_13, %c0_14], %16 {strides = array<i32>} : memref<4x16x16xf32, #tpu.memory_space<vmem>>, vector<4x16x16xf32>,
    } else {
    }
    %c16_i32 = arith.constant 16 : i32
    %3 = arith.muli %arg2, %c16_i32 : i32
    %c16_i32_1 = arith.constant 16 : i32
    %4 = arith.muli %arg1, %c16_i32_1 : i32
    %c15_i32 = arith.constant 15 : i32
    %5 = arith.addi %4, %c15_i32 : i32
    %6 = arith.cmpi sle, %3, %5 : i32
    %7 = arith.extui %6 : i1 to i32
    %c0_i32_2 = arith.constant 0 : i32
    %8 = arith.cmpi ne, %7, %c0_i32_2 : i32
    scf.if %8 {
      %c0 = arith.constant 0 : index
      %c0_5 = arith.constant 0 : index
      %c0_6 = arith.constant 0 : index
      %12 = vector.load %arg3[%c0, %c0_5, %c0_6] : memref<4x16x16xbf16, #tpu.memory_space<vmem>>, vector<4x16x16xbf16>
      %13 = arith.extf %12 : vector<4x16x16xbf16> to vector<4x16x16xf32>
      %cst = arith.constant 2.500000e-01 : f32
      %14 = vector.broadcast %cst : f32 to vector<4x16x16xf32>
      %15 = arith.mulf %13, %14 : vector<4x16x16xf32>
      %16 = arith.truncf %15 : vector<4x16x16xf32> to vector<4x16x16xbf16>
      %c0_7 = arith.constant 0 : index
      %c0_8 = arith.constant 0 : index
      %c0_9 = arith.constant 0 : index
      %17 = vector.load %arg4[%c0_7, %c0_8, %c0_9] : memref<4x16x16xbf16, #tpu.memory_space<vmem>>, vector<4x16x16xbf16>
      "tpu.trace_start"() <{level = 10 : i32, message = "bqd,bkd->bqk"}> : () -> ()
      %cst_10 = arith.constant dense<0.000000e+00> : vector<4x16x16xf32>
      %18 = tpu.matmul %16, %17, %cst_10 {dimension_numbers = #tpu.dot_dimension_numbers<[2], [2], [1], [1], [0, 0, 0, 1, 1, 1], [0], [0]>} : vector<4x16x16xbf16>, vector<4x16x16xbf16>, vector<4x16x16xf32> -> vector<4x16x16xf32>
      "tpu.trace_stop"() : () -> ()
      %c16_i32_11 = arith.constant 16 : i32
      %19 = arith.muli %arg1, %c16_i32_11 : i32
      %20 = tpu.iota {dimensions = array<i32: 0>} : vector<16x16xi32>
      %21 = vector.broadcast %19 : i32 to vector<16x16xi32>
      %22 = arith.addi %21, %20 : vector<16x16xi32>
      %c16_i32_12 = arith.constant 16 : i32
      %23 = arith.muli %arg2, %c16_i32_12 : i32
      %24 = tpu.iota {dimensions = array<i32: 1>} : vector<16x16xi32>
      %25 = vector.broadcast %23 : i32 to vector<16x16xi32>
      %26 = arith.addi %25, %24 : vector<16x16xi32>
      %27 = arith.cmpi sle, %26, %22 : vector<16x16xi32>
      %28 = vector.shape_cast %27 : vector<16x16xi1> to vector<1x16x16xi1>
      %cst_13 = arith.constant -1.000000e+30 : f32
      %29 = vector.shape_cast %28 : vector<1x16x16xi1> to vector<1x16x16xi1>
      %30 = vector.broadcast %29 : vector<1x16x16xi1> to vector<4x16x16xi1>
      %31 = vector.broadcast %cst_13 : f32 to vector<4x16x16xf32>
      %32 = arith.select %30, %18, %31 : vector<4x16x16xi1>, vector<4x16x16xf32>
      %c0_14 = arith.constant 0 : index
      %c0_15 = arith.constant 0 : index
      %c0_16 = arith.constant 0 : index
      %33 = vector.load %arg7[%c0_14, %c0_15, %c0_16] : memref<4x16x1xf32, #tpu.memory_space<vmem>>, vector<4x16x1xf32>
      %cst_17 = arith.constant dense<0xFF800000> : vector<4x16xf32>
      %34 = vector.multi_reduction <maximumf>, %32, %cst_17 [2] : vector<4x16x16xf32> to vector<4x16xf32>
      %35 = vector.shape_cast %34 : vector<4x16xf32> to vector<4x16x1xf32>
      %36 = arith.maximumf %33, %35 : vector<4x16x1xf32>
      %37 = arith.subf %33, %36 : vector<4x16x1xf32>
      %38 = math.exp %37 : vector<4x16x1xf32>
      %39 = vector.broadcast %36 : vector<4x16x1xf32> to vector<4x16x16xf32>
      %40 = arith.subf %32, %39 : vector<4x16x16xf32>
      %41 = math.exp %40 : vector<4x16x16xf32>
      %c0_18 = arith.constant 0 : index
      %c0_19 = arith.constant 0 : index
      %c0_20 = arith.constant 0 : index
      %42 = vector.load %arg8[%c0_18, %c0_19, %c0_20] : memref<4x16x1xf32, #tpu.memory_space<vmem>>, vector<4x16x1xf32>
      %43 = arith.mulf %38, %42 : vector<4x16x1xf32>
      %cst_21 = arith.constant dense<0.000000e+00> : vector<4x16xf32>
      %44 = vector.multi_reduction <add>, %41, %cst_21 [2] : vector<4x16x16xf32> to vector<4x16xf32>
      %45 = vector.shape_cast %44 : vector<4x16xf32> to vector<4x16x1xf32>
      %46 = arith.addf %43, %45 : vector<4x16x1xf32>
      %c0_22 = arith.constant 0 : index
      %c0_23 = arith.constant 0 : index
      %c0_24 = arith.constant 0 : index
      %47 = vector.load %arg8[%c0_22, %c0_23, %c0_24] : memref<4x16x1xf32, #tpu.memory_space<vmem>>, vector<4x16x1xf32>
      tpu.vector_store %arg8[%c0_22, %c0_23, %c0_24], %46 {strides = array<i32>} : memref<4x16x1xf32, #tpu.memory_space<vmem>>, vector<4x16x1xf32>,
      %c0_25 = arith.constant 0 : index
      %c0_26 = arith.constant 0 : index
      %c0_27 = arith.constant 0 : index
      %48 = vector.load %arg9[%c0_25, %c0_26, %c0_27] : memref<4x16x16xf32, #tpu.memory_space<vmem>>, vector<4x16x16xf32>
      %49 = vector.broadcast %38 : vector<4x16x1xf32> to vector<4x16x16xf32>
      %50 = arith.mulf %49, %48 : vector<4x16x16xf32>
      %51 = arith.truncf %41 : vector<4x16x16xf32> to vector<4x16x16xbf16>
      %c0_28 = arith.constant 0 : index
      %c0_29 = arith.constant 0 : index
      %c0_30 = arith.constant 0 : index
      %52 = vector.load %arg5[%c0_28, %c0_29, %c0_30] : memref<4x16x16xbf16, #tpu.memory_space<vmem>>, vector<4x16x16xbf16>
      "tpu.trace_start"() <{level = 10 : i32, message = "bqk,bkd->bqd"}> : () -> ()
      %cst_31 = arith.constant dense<0.000000e+00> : vector<4x16x16xf32>
      %53 = tpu.matmul %51, %52, %cst_31 {dimension_numbers = #tpu.dot_dimension_numbers<[2], [1], [1], [2], [0, 0, 0, 1, 1, 2], [0], [0]>} : vector<4x16x16xbf16>, vector<4x16x16xbf16>, vector<4x16x16xf32> -> vector<4x16x16xf32>
      "tpu.trace_stop"() : () -> ()
      %54 = arith.addf %50, %53 : vector<4x16x16xf32>
      %c0_32 = arith.constant 0 : index
      %c0_33 = arith.constant 0 : index
      %c0_34 = arith.constant 0 : index
      %55 = vector.load %arg9[%c0_32, %c0_33, %c0_34] : memref<4x16x16xf32, #tpu.memory_space<vmem>>, vector<4x16x16xf32>
      tpu.vector_store %arg9[%c0_32, %c0_33, %c0_34], %54 {strides = array<i32>} : memref<4x16x16xf32, #tpu.memory_space<vmem>>, vector<4x16x16xf32>,
      %c0_35 = arith.constant 0 : index
      %c0_36 = arith.constant 0 : index
      %c0_37 = arith.constant 0 : index
      %56 = vector.load %arg7[%c0_35, %c0_36, %c0_37] : memref<4x16x1xf32, #tpu.memory_space<vmem>>, vector<4x16x1xf32>
      tpu.vector_store %arg7[%c0_35, %c0_36, %c0_37], %36 {strides = array<i32>} : memref<4x16x1xf32, #tpu.memory_space<vmem>>, vector<4x16x1xf32>,
    } else {
    }
    %c0_i32_3 = arith.constant 0 : i32
    %9 = arith.cmpi eq, %arg2, %c0_i32_3 : i32
    %10 = arith.extui %9 : i1 to i32
    %c0_i32_4 = arith.constant 0 : i32
    %11 = arith.cmpi ne, %10, %c0_i32_4 : i32
    scf.if %11 {
      %c0 = arith.constant 0 : index
      %c0_5 = arith.constant 0 : index
      %c0_6 = arith.constant 0 : index
      %12 = vector.load %arg9[%c0, %c0_5, %c0_6] : memref<4x16x16xf32, #tpu.memory_space<vmem>>, vector<4x16x16xf32>
      %c0_7 = arith.constant 0 : index
      %c0_8 = arith.constant 0 : index
      %c0_9 = arith.constant 0 : index
      %13 = vector.load %arg8[%c0_7, %c0_8, %c0_9] : memref<4x16x1xf32, #tpu.memory_space<vmem>>, vector<4x16x1xf32>
      %14 = tpu.reciprocal %13 {approx = true} : vector<4x16x1xf32> -> vector<4x16x1xf32>
      %15 = vector.broadcast %14 : vector<4x16x1xf32> to vector<4x16x16xf32>
      %16 = arith.mulf %12, %15 : vector<4x16x16xf32>
      %17 = arith.truncf %16 : vector<4x16x16xf32> to vector<4x16x16xbf16>
      %c0_10 = arith.constant 0 : index
      %c0_11 = arith.constant 0 : index
      %c0_12 = arith.constant 0 : index
      %18 = vector.load %arg6[%c0_10, %c0_11, %c0_12] : memref<4x16x16xbf16, #tpu.memory_space<vmem>>, vector<4x16x16xbf16>
      tpu.vector_store %arg6[%c0_10, %c0_11, %c0_12], %17 {strides = array<i32>} : memref<4x16x16xbf16, #tpu.memory_space<vmem>>, vector<4x16x16xbf16>,
    } else {
    }
    return
  }
  func.func @transform_0(%arg0: i32, %arg1: i32, %arg2: i32) -> (i32, i32, i32) {
    %c0_i32 = arith.constant 0 : i32
    %c0_i32_0 = arith.constant 0 : i32
    return %arg0, %arg1, %c0_i32 : i32, i32, i32
  }
  func.func @transform_1(%arg0: i32, %arg1: i32, %arg2: i32) -> (i32, i32, i32) {
    %c0_i32 = arith.constant 0 : i32
    %c0_i32_0 = arith.constant 0 : i32
    return %arg0, %arg2, %c0_i32 : i32, i32, i32
  }
  func.func @transform_2(%arg0: i32, %arg1: i32, %arg2: i32) -> (i32, i32, i32) {
    %c0_i32 = arith.constant 0 : i32
    %c0_i32_0 = arith.constant 0 : i32
    return %arg0, %arg2, %c0_i32 : i32, i32, i32
  }
  func.func @transform_3(%arg0: i32, %arg1: i32, %arg2: i32) -> (i32, i32, i32) {
    %c0_i32 = arith.constant 0 : i32
    %c0_i32_0 = arith.constant 0 : i32
    return %arg0, %arg1, %c0_i32 : i32, i32, i32
  }
}

</mosaic_0001>

<bundles_post_ra>
// kernel: multihead_self_attention.3
= control target key start
LH: loop header
LB: loop body
LE: loop exit
PB: predicated region body
PF: predicated region fallthrough
CT: control target
= control target key end

     0   :  { %8 = vsyncpa [#allocation3], 0  ;;  %s926_s0 = inlined_call_operand.hbm [shape: f32[32,64], index: 0, kind: input, shape index: {}]   ;;  %s927_s1 = inlined_call_operand.hbm [shape: bf16[64,192], index: 1, kind: input, shape index: {}]   ;;  %s928_s2 = inlined_call_operand.vmem [shape: f32[1,192], index: 2, kind: input, shape index: {}]   ;;  %s929_s3 = inlined_call_operand.vmem [shape: bf16[32,192], index: 3, kind: output, shape index: {}]  }
   0x1   :  { %10 = vsyncpa [#allocation3 + $0x1], 0 }
   0x2   :  { %11 = vsyncpa [#allocation5], 0  ;;  %s760_s12 = smov 0   ;;  %s762_s13 = smov 0  }
   0x3   :  { %s764_s14 = smov 0   ;;  %s766_s15 = smov 0  }
   0x4   :  { %s768_s16 = smov 0   ;;  %s770_s17 = smov 0  }
   0x5 LB: > { %s508_s18 = sadd.s32 4294967295, %s733_s17   ;;  %p49_p0 = scmp.ne.s32.totalorder %s717_s13, %s713_s12  ;;  %s733_s17 = sphi %s770_s17, %s17_s17   ;;  %s729_s16 = sphi %s768_s16, %s946_s16   ;;  %s725_s15 = sphi %s766_s15, %s945_s15   ;;  %s721_s14 = sphi %s764_s14, %s944_s14   ;;  %s717_s13 = sphi %s762_s13, %s943_s13   ;;  %s713_s12 = sphi %s760_s12, %s942_s12  }
   0x6   : > { %p790_p1 = scmp.eq.s32.totalorder %s508_s18, 0  ;;  %p510_p2 = scmp.ge.s32.totalorder %s733_s17, 1 }
   0x7   : > { %p140_p3 = scmp.lt.s32.totalorder %s733_s17, 3  ;;  %s735_s22 = smov [#allocation4]  }
   0x8   : > { %s934_s19 = scalar_select %p790_p1, 1, 0 }
   0x9   : > { %p798_p4 = por %p790_p1, %p49_p0  ;;  %p802_p5 = pnand %p510_p2, %p140_p3 }
   0xa   : > { %s155_s23 = sshll.u32 %s735_s22, 4  ;;  %s29_s25 = sadd.s32 1, %s729_s16  ;;  %s156_s23 = int_to_ptr.vmem [resolvable:$true] %s155_s23 }
   0xb   : > { %s935_s20 = scalar_select %p798_p4, 1, 0 }
   0xc   : > { %s936_s21 = scalar_select %p802_p5, 1, 0 }
   0xd   : > { %p546_p6 = pneg %p802_p5  ;;  %s621_s28 = scalar_lea.hbm %s927_s1, 1024 }
   0xe   : > { %p622_p8 = scmp.ne.s32.totalorder %s927_s1, %s621_s28  ;;  %p628_p12 = scmp.lt.u32.totalorder %s621_s28, %s927_s1 }
   0xf   : > { %p810_p7 = pnand %p546_p6, %p790_p1 }
  0x11   : > { %p623_p9 = pneg %p810_p7 }
  0x13   : > { %p624_p10 = pnand %p623_p9, %p622_p8 }
  0x15   : > { %p625_p11 = pneg %p624_p10 }
  0x17   : > { %p630_p13 = pnand %p628_p12, %p625_p11 }
  0x19   : > { %633 = shalt.err (!%p630_p13)
}
  0x1a   : > { %s634_s6 = scalar_lea.vmem %s156_s23, 1024  ;;  %p642_p6 = scmp.lt.s32.totalorder %s156_s23, %s156_s23 }
  0x1b   : > { %p635_p0 = scmp.ne.s32.totalorder %s156_s23, %s634_s6  ;;  %p643_p1 = scmp.lt.s32.totalorder %s634_s6, %s634_s6 }
  0x1d   : > { %p637_p2 = pnand %p635_p0, %p623_p9  ;;  %p644_p4 = por %p643_p1, %p642_p6 }
  0x1f   : > { %p638_p3 = pneg %p637_p2 }
  0x21   : > { %p645_p5 = pnand %p644_p4, %p638_p3 }
  0x23   : > { %648 = shalt.err (!%p645_p5)
}
  0x24   : > { %s736_s7 = smov 128   ;;  %s737_s8 = smov 8  }
  0x25   : > { %549 = dma.hbm_to_vmem [thread:$0]  (!%p810_p7), %s927_s1, 1024, %s156_s23, [#allocation5], %s736_s7, %s736_s7, %s737_s8  }
  0x26   : > { %p31_p1 = scmp.ge.s32.totalorder %s29_s25, 2  ;;  %s36_s11 = sadd.s32 1, %s721_s14 }
  0x27   : > { %p43_p4 = scmp.ne.s32.totalorder %s721_s14, %s717_s13  ;;  %p44_p5 = scmp.eq.s32.totalorder %s733_s17, 0 }
  0x28   : > { %s948_s25 = smov (%p31_p1, %s29_s25), 0  ;;  %p555_p9 = scmp.lt.s32.totalorder %s733_s17, 2 }
  0x29   : > { %p45_p8 = por %p44_p5, %p43_p4  ;;  %s33_s12 = ssub.s32 %s729_s16, %s948_s25 }
  0x2a   : > { %s177_s18 = sand.u32 1, %s721_s14   ;;  %p34_p10 = scmp.eq.s32.totalorder %s33_s12, 0 }
  0x2b   : > { %s514_s22 = sshll.u32 %s177_s18, 4  ;;  %s536_s24 = sshll.u32 %s729_s16, 8 }
  0x2c   : > { %s846_s26 = scalar_select %p34_p10, %s721_s14, %s36_s11  }
  0x2d   : > { %s851_s23 = scalar_lea.hbm %s926_s0, %s536_s24  ;;  %s181_s29 = scalar_lea.vmem [#allocation2], %s514_s22 }
  0x2e   : > { %s188_s30 = sshll.u32 %s181_s29, 4  ;;  %p853_p7 = pnand %p555_p9, %p45_p8  ;;  %s857_s30 = int_to_ptr.vmem [resolvable:$true] %s188_s30 }
  0x2f   : > { %s859_s5 = scalar_lea.sflag [#allocation3], %s177_s18  ;;  %s649_s6 = scalar_lea.hbm %s851_s23, 256 }
  0x30   : > { %p650_p11 = scmp.ne.s32.totalorder %s851_s23, %s649_s6  ;;  %p651_p12 = pneg %p853_p7 }
  0x31   : > { %s654_s11 = scalar_lea.hbm %s926_s0, 512  ;;  %p655_p2 = scmp.lt.u32.totalorder %s851_s23, %s926_s0 }
  0x32   : > { %p652_p13 = pnand %p651_p12, %p650_p11  ;;  %p656_p3 = scmp.lt.u32.totalorder %s654_s11, %s649_s6 }
  0x33   : > { %p658_p1 = scmp.lt.u32.totalorder %s649_s6, %s851_s23 }
  0x34   : > { %p653_p0 = pneg %p652_p13  ;;  %p657_p6 = por %p656_p3, %p655_p2 }
  0x36   : > { %p659_p4 = por %p658_p1, %p657_p6 }
  0x38   : > { %p660_p5 = pnand %p659_p4, %p653_p0 }
  0x3a   : > { %663 = shalt.err (!%p660_p5)
}
  0x3b   : > { %s664_s18 = scalar_lea.vmem %s857_s30, 256  ;;  %s738_s24 = smov [#allocation2]  }
  0x3c   : > { %p665_p8 = scmp.ne.s32.totalorder %s857_s30, %s664_s18  ;;  %s669_s27 = sshll.u32 %s738_s24, 4  ;;  %s670_s27 = int_to_ptr.vmem [resolvable:$false] %s669_s27 }
  0x3d   : > { %s671_s28 = scalar_lea.vmem %s670_s27, 512  ;;  %p672_p11 = scmp.lt.s32.totalorder %s857_s30, %s670_s27 }
  0x3e   : > { %p667_p9 = pnand %p665_p8, %p651_p12  ;;  %p673_p13 = scmp.lt.s32.totalorder %s671_s28, %s664_s18 }
  0x40   : > { %p668_p10 = pneg %p667_p9  ;;  %p674_p2 = por %p673_p13, %p672_p11 }
  0x42   : > { %p675_p3 = pnand %p674_p2, %p668_p10 }
  0x44   : > { %678 = shalt.err (!%p675_p3)
}
  0x45   : > { %553 = dma.hbm_to_vmem [thread:$0]  (!%p853_p7), %s851_s23, 256, %s857_s30, %s859_s5, %s736_s7, %s736_s7, %s737_s8  }
  0x46   : > { %p939_p12 = scmp.ne.s32.totalorder %s936_s21, 0 }
  0x47   : > { %s202_s29 = sand.u32 (!%p939_p12), 1, %s717_s13   ;;  %p940_p0 = scmp.ne.s32.totalorder (!%p939_p12), %s935_s20, 0 }
  0x48   : > { %200 = sbr.rel (%p939_p12) target bundleno = 320 (0x140), region = 32  ;;  %s518_s6 = sshll.u32 (!%p939_p12), %s202_s29, 4 }
  0x49   : > { %s203_s9 = scalar_lea.sflag (!%p939_p12), [#allocation3], %s202_s29  ;;  %s206_s10 = scalar_lea.vmem (!%p939_p12), [#allocation2], %s518_s6 }
  0x4f   : > { %704 = dma.done.wait (%p940_p0), %s203_s9, 256  }
  0x50   : > { %706 = vsyncadd (%p940_p0), %s203_s9, 4294967040  ;;  %p941_p6 = scmp.ne.s32.totalorder %s934_s19, 0 }
  0x52   : > { %708 = dma.done.wait (%p941_p6), [#allocation5], 1024  }
  0x53   : > { %710 = vsyncadd (%p941_p6), [#allocation5], 4294966272  ;;  %v739_v0 = vmov 0   ;;  %v609_v1 = vld [vmem:[#allocation4 + $0x4] ss:$8 sps:$4 sm:$0xff]   ;;  %vm325_vm0 = vcmask 523264   ;;  %v275_v12 = vlaneseq }
  0x54   : > { %361 = vmatprep.mubr.bf16.mxu0 %v739_v0  ;;  %v611_v2 = vld [vmem:[#allocation4] ss:$8 sps:$4 sm:$0xff]   ;;  %329 = vmatprep.subr.bf16.mxu0 %v609_v1  ;;  %v612_v3 = vld [vmem:[#allocation4 + $0x14] ss:$8 sps:$4 sm:$0xff]   ;;  %v614_v4 = vld [vmem:[#allocation4 + $0x10] ss:$8 sps:$4 sm:$0xff]  }
  0x55   : > { %330 = vmatpush1.bf16.msra.mxu0 %v611_v2  ;;  %v615_v5 = vld [vmem:[#allocation4 + $0x24] ss:$8 sps:$4 sm:$0xff]   ;;  %v617_v6 = vld [vmem:[#allocation4 + $0x20] ss:$8 sps:$4 sm:$0xff]   ;;  %v618_v7 = vld [vmem:[#allocation4 + $0x34] ss:$8 sps:$4 sm:$0xff]  }
  0x56   : > { %331 = vmatprep.subr.bf16.mxu0 %v612_v3  ;;  %v620_v8 = vld [vmem:[#allocation4 + $0x30] ss:$8 sps:$4 sm:$0xff]   ;;  %v276_v13 = vshrl.u32 %v275_v12, 7  ;;  %s520_s19 = sshll.u32 %s725_s15, 1  ;;  %v273_v15 = vld [vmem:[%s928_s2] sm:$0x3] }
  0x57   : > { %v262_v9 = vld [vmem:[%s206_s10] sm:$0xff]  ;;  %v263_v10 = vld [vmem:[%s206_s10 + $0x8] sm:$0xff]  ;;  %p251_p7 = scmp.lt.s32.totalorder %s520_s19, 3  ;;  %vm384_vm1 = vcmask 1043456   ;;  %vm385_vm2 = vcmask 523268  }
  0x58   : > { %v264_v11 = vpack.c.bf16 %v263_v10, %v262_v9  ;;  %v277_v14 = vsub.s32 0, %v276_v13  ;;  %v281_v16 = vsub.s32 1, %v276_v13  ;;  %vm386_vm3 = vmor %vm385_vm2, %vm384_vm1 }
  0x59   : > { %332 = vmatpush1.bf16.msra.mxu0 %v614_v4  ;;  %s950_s19 = smov (!%p251_p7, %s520_s19), 3 }
  0x5a   : > { %333 = vmatprep.subr.bf16.mxu0 %v615_v5  ;;  %v278_v17 = vrot.slane %v273_v15, %v277_v14  ;;  %v282_v18 = vrot.slane %v273_v15, %v281_v16  ;;  %s537_s7 = sshll.u32 %s950_s19, 3 }
  0x5b   : > { %s258_s23 = scalar_lea.vmem %s929_s3, %s537_s7 }
  0x5d   : > { %334 = vmatpush1.bf16.msra.mxu0 %v617_v6 }
  0x5e   : > { %335 = vmatprep.subr.bf16.mxu0 %v618_v7 }
  0x61   : > { %336 = vmatpush1.bf16.msra.mxu0 %v620_v8 }
  0x64   : > { %531 = vmatmul.mubr.msk.bf16.vlgmr.msra.gmra.mrb[0].mxu0 %vm325_vm0, %v264_v11 }
 0x137   : > { %v363_v19 = vpop.f32.mrb[0].mxu0 }
 0x138   : > { %v364_v20 = vadd.f32 %v363_v19, %v278_v17  ;;  %v365_v21 = vpop.f32.mrb[1].mxu0 }
 0x139   : > { %v366_v22 = vadd.f32 %v365_v21, %v282_v18  ;;  %v367_v23 = vpop.f32.mrb[2].mxu0 }
 0x13a   : > { %v368_v24 = vadd.f32 %v367_v23, %v278_v17  ;;  %v369_v25 = vpop.f32.mrb[3].mxu0 }
 0x13b   : > { %v538_v26 = vpack.c.bf16 %v366_v22, %v364_v20  ;;  %v370_v27 = vadd.f32 %v369_v25, %v282_v18 }
 0x13d   : > { %387 = vst.msk [vmem:[%s258_s23] sm:$0xff] %vm386_vm3, %v538_v26  ;;  %v539_v28 = vpack.c.bf16 %v370_v27, %v368_v24 }
 0x13f   : > { %388 = vst.msk [vmem:[%s258_s23 + $0x8] sm:$0xff] %vm386_vm3, %v539_v28 }
 0x140 PF: > { %s17_s17 = sadd.s32 1, %s733_s17   ;;  %s942_s12 = smov %s717_s13 }
 0x141   : > { %p14_p1 = scmp.ge.s32.totalorder %s17_s17, 4   ;;  %s943_s13 = smov %s721_s14 }
 0x142   : > { %s944_s14 = smov %s846_s26  ;;  %s945_s15 = smov %s729_s16 }
 0x143   : > { %s946_s16 = smov %s948_s25  ;;  %16 = sbr.rel (!%p14_p1) target bundleno = 5 (0x5), region = 80 }
 0x14a   :  { %422 = vsyncpa [#allocation3], 1 }
 0x14b   :  { %424 = vsyncpa [#allocation3 + $0x1], 1 }
 0x14c   :  { %425 = vsyncpa [#allocation5], 1 }

// kernel: multihead_self_attention.5
= control target key start
LH: loop header
LB: loop body
LE: loop exit
PB: predicated region body
PF: predicated region fallthrough
CT: control target
= control target key end

     0   :  { %8 = vsyncpa [#allocation3], 0  ;;  %s766_s0 = inlined_call_operand.vmem [shape: bf16[32,64], index: 0, kind: input, shape index: {}]   ;;  %s767_s1 = inlined_call_operand.vmem [shape: bf16[64,64], index: 1, kind: input, shape index: {}]   ;;  %s768_s2 = inlined_call_operand.vmem [shape: f32[1,64], index: 2, kind: input, shape index: {}]   ;;  %s769_s3 = inlined_call_operand.hbm [shape: f32[32,64], index: 3, kind: output, shape index: {}]  }
   0x1   :  { %10 = vsyncpa [#allocation3 + $0x1], 0  ;;  %s634_s12 = smov 0   ;;  %s636_s13 = smov 0  }
   0x2   :  { %s638_s14 = smov 0   ;;  %s640_s15 = smov 0  }
   0x3   :  { %s642_s16 = smov 0   ;;  %s644_s17 = smov 0  }
   0x4 LB: > { %s425_s18 = sadd.s32 4294967295, %s607_s17   ;;  %s426_s19 = sadd.s32 4294967294, %s607_s17   ;;  %s607_s17 = sphi %s644_s17, %s16_s17   ;;  %s603_s16 = sphi %s642_s16, %s776_s16   ;;  %s599_s15 = sphi %s640_s15, %s775_s15   ;;  %s595_s14 = sphi %s638_s14, %s774_s14   ;;  %s591_s13 = sphi %s636_s13, %s773_s13   ;;  %s587_s12 = sphi %s634_s12, %s772_s12  }
   0x5   : > { %s28_s20 = sadd.s32 1, %s603_s16  ;;  %s115_s21 = sadd.s32 1, %s595_s14 }
   0x6   : > { %p30_p0 = scmp.ge.s32.totalorder %s28_s20, 2  ;;  %p125_p1 = scmp.ne.s32.totalorder %s595_s14, %s591_s13 }
   0x7   : > { %p126_p2 = scmp.eq.s32.totalorder %s425_s18, 1  ;;  %p131_p3 = scmp.ne.s32.totalorder %s591_s13, %s587_s12 }
   0x8   : > { %s778_s20 = smov (%p30_p0, %s28_s20), 0  ;;  %p132_p5 = scmp.eq.s32.totalorder %s426_s19, 1 }
   0x9   : > { %p674_p4 = por %p126_p2, %p125_p1  ;;  %s110_s23 = ssub.s32 %s603_s16, %s778_s20 }
   0xa   : > { %p431_p6 = scmp.ge.s32.totalorder %s607_s17, 1  ;;  %p113_p7 = scmp.eq.s32.totalorder %s110_s23, 0 }
   0xb   : > { %p681_p8 = por %p132_p5, %p131_p3  ;;  %p172_p9 = scmp.lt.s32.totalorder %s607_s17, 3 }
   0xc   : > { %s687_s25 = scalar_select %p113_p7, %s595_s14, %s115_s21  }
   0xd   : > { %p173_p10 = pnand %p431_p6, %p172_p9 }
   0xe   : > { %v524_v0 = vld [vmem:[%s767_s1] sm:$0xff] (!%p173_p10)   ;;  %v609_v1 = vmov (!%p173_p10), 0.0   ;;  %v525_v2 = vld [vmem:[%s767_s1 + $0x8] sm:$0xff] (!%p173_p10)   ;;  %vm610_vm0 = vmmov (!%p173_p10), 0   ;;  %s433_s30 = sshll.u32 (!%p173_p10), %s599_s15, 1  ;;  %v526_v3 = vld [vmem:[%s767_s1 + $0x10] sm:$0xff] (!%p173_p10)  }
   0xf   : > { %176 = sbr.rel (%p173_p10) target bundleno = 262 (0x106), region = 32  ;;  %453 = vmatprep.subr.bf16.mxu0 (!%p173_p10), %v609_v1  ;;  %461 = vmatprep.mubr.msk.bf16.mxu0 (!%p173_p10), %vm610_vm0, %v609_v1  ;;  %p204_p11 = scmp.lt.s32.totalorder (!%p173_p10), %s433_s30, 3  ;;  %v527_v4 = vld [vmem:[%s767_s1 + $0x18] sm:$0xff] (!%p173_p10)   ;;  %vm264_vm1 = vcmask (!%p173_p10), 523264   ;;  %v435_v6 = vld [vmem:[%s768_s2] ss:$0 sm:$0xff] (!%p173_p10) }
  0x10   : > { %454 = vmatpush3.bf16.msra.mxu0 (!%p173_p10), %v524_v0  ;;  %s200_s18 = sand.u32 (!%p173_p10), 1, %s591_s13   ;;  %s447_s28 = sshll.u32 (!%p173_p10), %s599_s15, 8 }
  0x11   : > { %455 = vmatprep.subr.bf16.mxu0 (!%p173_p10), %v609_v1  ;;  %s432_s19 = sshll.u32 (!%p173_p10), %s200_s18, 4  ;;  %s716_s4 = scalar_lea.hbm (!%p173_p10), %s769_s3, %s447_s28 }
  0x12   : > { %s202_s26 = scalar_lea.vmem (!%p173_p10), [#allocation2], %s432_s19  ;;  %s720_s15 = scalar_lea.sflag (!%p173_p10), [#allocation3], %s200_s18 }
  0x13   : > { %s326_s27 = sshll.u32 (!%p173_p10), %s202_s26, 4  ;;  %s711_s27 = int_to_ptr.vmem [resolvable:$true] %s326_s27 }
  0x14   : > { %456 = vmatpush3.bf16.msra.mxu0 (!%p173_p10), %v525_v2  ;;  %s529_s5 = scalar_lea.vmem (!%p173_p10), %s711_s27, 256 }
  0x15   : > { %457 = vmatprep.subr.bf16.mxu0 (!%p173_p10), %v609_v1  ;;  %p530_p12 = scmp.ne.s32.totalorder (!%p173_p10), %s711_s27, %s529_s5 }
  0x16   : > { %s780_s30 = smov (!%p204_p11, %s433_s30), 3 }
  0x17   : > { %s434_s6 = sshll.u32 %s780_s30, 2  ;;  %p531_p13 = pnand %p530_p12, %p674_p4 }
  0x18   : > { %s207_s9 = scalar_lea.vmem %s766_s0, %s434_s6  ;;  %458 = vmatpush3.bf16.msra.mxu0 %v526_v3  ;;  %s611_s6 = smov [#allocation2]  }
  0x19   : > { %459 = vmatprep.subr.bf16.mxu0 %v609_v1  ;;  %v528_v5 = vld [vmem:[%s207_s9] sm:$0xff]   ;;  %p532_p0 = pneg %p531_p13  ;;  %s533_s7 = sshll.u32 %s611_s6, 4  ;;  %s534_s7 = int_to_ptr.vmem [resolvable:$false] %s533_s7 }
  0x1a   : > { %s535_s8 = scalar_lea.vmem %s534_s7, 512  ;;  %p536_p1 = scmp.lt.s32.totalorder %s711_s27, %s534_s7 }
  0x1b   : > { %p537_p2 = scmp.lt.s32.totalorder %s535_s8, %s529_s5 }
  0x1c   : > { %460 = vmatpush3.bf16.msra.mxu0 %v527_v4 }
  0x1d   : > { %p538_p3 = por %p537_p2, %p536_p1 }
  0x1f   : > { %462 = vmatmul.mubr.msk.bf16.vlgmr.msra.gmra.mrb[0].mxu0 %vm264_vm1, %v528_v5  ;;  %p539_p5 = pnand %p538_p3, %p532_p0 }
  0xf2   : > { %v302_v7 = vpop.f32.mrb[0].mxu0 }
  0xf3   : > { %v303_v8 = vadd.f32 %v435_v6, %v302_v7  ;;  %v463_v9 = vpop.f32.mrb[1].mxu0 }
  0xf4   : > { %v305_v10 = vpop.f32.mrb[2].mxu0 }
  0xf5   : > { %309 = vst.msk [vmem:[%s202_s26] sm:$0xff] %vm264_vm1, %v303_v8  ;;  %v306_v11 = vadd.f32 %v435_v6, %v305_v10  ;;  %v464_v12 = vpop.f32.mrb[3].mxu0 }
  0xf7   : > { %310 = vst.msk [vmem:[%s202_s26 + $0x8] sm:$0xff] %vm264_vm1, %v306_v11 }
  0xf8   : > { %542 = shalt.err (!%p539_p5)
}
  0xf9   : > { %s543_s9 = scalar_lea.hbm %s716_s4, 256  ;;  %s547_s18 = scalar_lea.hbm %s769_s3, 512 }
  0xfa   : > { %p544_p6 = scmp.ne.s32.totalorder %s716_s4, %s543_s9  ;;  %p548_p10 = scmp.lt.u32.totalorder %s716_s4, %s769_s3 }
  0xfb   : > { %p549_p11 = scmp.lt.u32.totalorder %s547_s18, %s543_s9  ;;  %p551_p13 = scmp.lt.u32.totalorder %s543_s9, %s716_s4 }
  0xfc   : > { %p545_p7 = pnand %p544_p6, %p674_p4 }
  0xfd   : > { %p550_p12 = por %p549_p11, %p548_p10 }
  0xfe   : > { %p546_p9 = pneg %p545_p7 }
  0xff   : > { %p552_p0 = por %p551_p13, %p550_p12 }
 0x101   : > { %p553_p1 = pnand %p552_p0, %p546_p9 }
 0x103   : > { %556 = shalt.err (!%p553_p1)
}
 0x104   : > { %s612_s23 = smov 128   ;;  %s613_s26 = smov 8  }
 0x105   : > { %465 = dma.vmem_to_hbm [thread:$0]  (%p674_p4), %s711_s27, 256, %s716_s4, %s720_s15, %s612_s23, %s612_s23, %s613_s26  }
 0x106 PF: > { %p471_p2 = scmp.ge.s32.totalorder %s607_s17, 2  ;;  %s341_s28 = sand.u32 1, %s587_s12  }
 0x107   : > { %s342_s29 = scalar_lea.sflag [#allocation3], %s341_s28 }
 0x108   : > { %p468_p3 = pnand %p471_p2, %p681_p8 }
 0x10a   : > { %582 = dma.done.wait (!%p468_p3), %s342_s29, 256  }
 0x10b   : > { %584 = vsyncadd (!%p468_p3), %s342_s29, 4294967040  ;;  %s16_s17 = sadd.s32 1, %s607_s17   ;;  %s772_s12 = smov %s591_s13 }
 0x10c   : > { %p13_p5 = scmp.ge.s32.totalorder %s16_s17, 4   ;;  %s773_s13 = smov %s595_s14 }
 0x10d   : > { %s774_s14 = smov %s687_s25  ;;  %s775_s15 = smov %s603_s16 }
 0x10e   : > { %s776_s16 = smov %s778_s20  ;;  %15 = sbr.rel (!%p13_p5) target bundleno = 4 (0x4), region = 73 }
 0x115   :  { %347 = vsyncpa [#allocation3], 1 }
 0x116   :  { %349 = vsyncpa [#allocation3 + $0x1], 1 }

// kernel: multihead_self_attention.4
= control target key start
LH: loop header
LB: loop body
LE: loop exit
PB: predicated region body
PF: predicated region fallthrough
CT: control target
= control target key end

     0   :  { %s1608_s12 = smov 0   ;;  %s1610_s13 = smov 0   ;;  %s1929_s0 = inlined_call_operand.vmem [shape: bf16[8,16,16], index: 0, kind: input, shape index: {}]   ;;  %s1930_s1 = inlined_call_operand.vmem [shape: bf16[8,16,16], index: 1, kind: input, shape index: {}]   ;;  %s1931_s2 = inlined_call_operand.vmem [shape: bf16[8,16,16], index: 2, kind: input, shape index: {}]   ;;  %s1932_s3 = inlined_call_operand.vmem [shape: bf16[8,16,16], index: 3, kind: output, shape index: {}]  }
   0x1   :  { %s1612_s14 = smov 0  }
   0x2 LB: > { %s32_s15 = sadd.s32 1, %s1578_s13  ;;  %p1340_p0 = scmp.ge.s32.totalorder %s1582_s14, 1  ;;  %s1582_s14 = sphi %s1612_s14, %s13_s14   ;;  %s1578_s13 = sphi %s1610_s13, %s1934_s13   ;;  %s1574_s12 = sphi %s1608_s12, %s1933_s12  }
   0x3   : > { %p34_p1 = scmp.ge.s32.totalorder %s32_s15, 2  ;;  %p205_p2 = scmp.lt.s32.totalorder %s1582_s14, 3 }
   0x5   : > { %s1936_s15 = smov (%p34_p1, %s32_s15), 0  ;;  %p206_p3 = pnand %p1340_p0, %p205_p2 }
   0x6   : > { %s1341_s16 = sshll.u32 (!%p206_p3), %s1574_s12, 2  ;;  %vm329_vm0 = vcmask (!%p206_p3), 130048   ;;  %v1584_v0 = vmov (!%p206_p3), 0.0   ;;  %vm1585_vm1 = vmmov (!%p206_p3), 0   ;;  %vm312_vm2 = vcmask (!%p206_p3), 7168  }
   0x7   : > { %209 = sbr.rel (%p206_p3) target bundleno = 848 (0x350), region = 32  ;;  %1426 = vmatprep.subr.bf16.mxu0 (!%p206_p3), %v1584_v0  ;;  %1432 = vmatprep.subr.bf16.mxu1 (!%p206_p3), %v1584_v0  ;;  %p261_p4 = scmp.lt.s32.totalorder (!%p206_p3), %s1341_s16, 7  ;;  %330 = vst.msk [vmem:[#allocation4] sm:$0xff] (!%p206_p3), %vm329_vm0, %v1584_v0  ;;  %331 = vst.msk [vmem:[#allocation4 + $0x8] sm:$0xff] (!%p206_p3), %vm329_vm0, %v1584_v0  ;;  %v1586_v33 = vmov (!%p206_p3), -inf   ;;  %v590_v34 = vlaneseq (!%p206_p3)  ;;  %vm1198_vm5 = vcmask (!%p206_p3), 125952  }
   0x8   : > { %332 = vst.msk [vmem:[#allocation4 + $0x10] sm:$0xff] (!%p206_p3), %vm329_vm0, %v1584_v0  ;;  %333 = vst.msk [vmem:[#allocation4 + $0x18] sm:$0xff] (!%p206_p3), %vm329_vm0, %v1584_v0  ;;  %1428 = vmatprep.mubr.msk.bf16.mxu0 (!%p206_p3), %vm1585_vm1, %v1584_v0  ;;  %1434 = vmatprep.mubr.msk.bf16.mxu1 (!%p206_p3), %vm1585_vm1, %v1584_v0 }
   0x9   : > { %334 = vst.msk [vmem:[#allocation4 + $0x20] sm:$0xff] (!%p206_p3), %vm329_vm0, %v1584_v0  ;;  %335 = vst.msk [vmem:[#allocation4 + $0x28] sm:$0xff] (!%p206_p3), %vm329_vm0, %v1584_v0  ;;  %v591_v35 = vshrl.u32 (!%p206_p3), %v590_v34, 7  ;;  %v597_v36 = vand.u32 (!%p206_p3), 127, %v590_v34 }
   0xa   : > { %336 = vst.msk [vmem:[#allocation4 + $0x30] sm:$0xff] (!%p206_p3), %vm329_vm0, %v1584_v0  ;;  %337 = vst.msk [vmem:[#allocation4 + $0x38] sm:$0xff] (!%p206_p3), %vm329_vm0, %v1584_v0 }
   0xb   : > { %315 = vst.msk [vmem:[#allocation2 + $0x10] sm:$0xff] (!%p206_p3), %vm312_vm2, %v1586_v33  ;;  %313 = vst.msk [vmem:[#allocation2] sm:$0xff] (!%p206_p3), %vm312_vm2, %v1586_v33  ;;  %v592_v37 = vadd.s32 (!%p206_p3), 8, %v591_v35  ;;  %vm600_vm3 = vcmp.le.s32.totalorder (!%p206_p3), %v597_v36, %v591_v35 }
   0xc   : > { %314 = vst.msk [vmem:[#allocation2 + $0x8] sm:$0xff] (!%p206_p3), %vm312_vm2, %v1586_v33  ;;  %316 = vst.msk [vmem:[#allocation2 + $0x18] sm:$0xff] (!%p206_p3), %vm312_vm2, %v1586_v33 }
   0xd   : > { %317 = vst.msk [vmem:[#allocation2 + $0x20] sm:$0xff] (!%p206_p3), %vm312_vm2, %v1586_v33  ;;  %318 = vst.msk [vmem:[#allocation2 + $0x28] sm:$0xff] (!%p206_p3), %vm312_vm2, %v1586_v33  ;;  %vm601_vm4 = vcmp.le.s32.totalorder (!%p206_p3), %v597_v36, %v592_v37 }
   0xe   : > { %s1938_s16 = smov (!%p261_p4, %s1341_s16), 7  ;;  %319 = vst.msk [vmem:[#allocation2 + $0x30] sm:$0xff] %vm312_vm2, %v1586_v33  ;;  %320 = vst.msk [vmem:[#allocation2 + $0x38] sm:$0xff] %vm312_vm2, %v1586_v33 }
   0xf   : > { %s1648_s17 = sshll.u32 %s1938_s16, 3  ;;  %321 = vst.msk [vmem:[#allocation3] sm:$0xff] %vm312_vm2, %v1584_v0  ;;  %322 = vst.msk [vmem:[#allocation3 + $0x8] sm:$0xff] %vm312_vm2, %v1584_v0 }
  0x10   : > { %s280_s20 = scalar_lea.vmem %s1930_s1, %s1648_s17  ;;  %s268_s23 = scalar_lea.vmem %s1929_s0, %s1648_s17  ;;  %323 = vst.msk [vmem:[#allocation3 + $0x10] sm:$0xff] %vm312_vm2, %v1584_v0  ;;  %324 = vst.msk [vmem:[#allocation3 + $0x18] sm:$0xff] %vm312_vm2, %v1584_v0 }
  0x11   : > { %v1504_v1 = vld [vmem:[%s280_s20] sm:$0xff]   ;;  %v1505_v2 = vld [vmem:[%s280_s20 + $0x8] sm:$0xff]   ;;  %v1506_v11 = vld [vmem:[%s280_s20 + $0x10] sm:$0xff]   ;;  %325 = vst.msk [vmem:[#allocation3 + $0x20] sm:$0xff] %vm312_vm2, %v1584_v0  ;;  %s1823_s26 = scalar_lea.vmem %s1931_s2, %s1648_s17  ;;  %s1902_s29 = scalar_lea.vmem %s1932_s3, %s1648_s17 }
  0x12   : > { %v391_v3 = vsel %vm329_vm0, %v1504_v1, 0  ;;  %v1392_v4 = vld [vmem:[%s268_s23] sm:$0xff]   ;;  %v1407_v5 = vld [vmem:[%s268_s23 + $0x8] sm:$0xff]   ;;  %v443_v6 = vsel %vm329_vm0, %v1505_v2, 0  ;;  %v1408_v12 = vld [vmem:[%s268_s23 + $0x10] sm:$0xff]   ;;  %v495_v25 = vsel %vm329_vm0, %v1506_v11, 0 }
  0x13   : > { %1427 = vmatpush3.bf16.xpose.msra.mxu0 %v391_v3  ;;  %v1393_v7 = vunpack.c.l.bf16 %v1392_v4  ;;  %v1394_v8 = vunpack.c.h.bf16 %v1392_v4  ;;  %v1397_v9 = vunpack.c.l.bf16 %v1407_v5  ;;  %1433 = vmatpush3.bf16.xpose.msra.mxu1 %v443_v6  ;;  %v1398_v10 = vunpack.c.h.bf16 %v1407_v5  ;;  %v1507_v16 = vld [vmem:[%s280_s20 + $0x18] sm:$0xff]   ;;  %326 = vst.msk [vmem:[#allocation3 + $0x28] sm:$0xff] %vm312_vm2, %v1584_v0  ;;  %327 = vst.msk [vmem:[#allocation3 + $0x30] sm:$0xff] %vm312_vm2, %v1584_v0 }
  0x14   : > { %1438 = vmatprep.subr.bf16.mxu0 %v1584_v0  ;;  %1444 = vmatprep.subr.bf16.mxu1 %v1584_v0  ;;  %v1409_v17 = vld [vmem:[%s268_s23 + $0x18] sm:$0xff]   ;;  %v1401_v19 = vunpack.c.l.bf16 %v1408_v12  ;;  %v1402_v20 = vunpack.c.h.bf16 %v1408_v12  ;;  %v547_v26 = vsel %vm329_vm0, %v1507_v16, 0  ;;  %328 = vst.msk [vmem:[#allocation3 + $0x38] sm:$0xff] %vm312_vm2, %v1584_v0 }
  0x15   : > { %v361_v13 = vmul.f32 0.25, %v1393_v7  ;;  %v362_v14 = vmul.f32 0.25, %v1394_v8  ;;  %v363_v15 = vmul.f32 0.25, %v1397_v9  ;;  %v364_v18 = vmul.f32 0.25, %v1398_v10  ;;  %v1742_v8 = vld [vmem:[#allocation2] sm:$0xff]  ;;  %v1744_v9 = vld [vmem:[#allocation2 + $0x10] sm:$0xff] }
  0x16   : > { %v1405_v22 = vunpack.c.l.bf16 %v1409_v17  ;;  %v1406_v23 = vunpack.c.h.bf16 %v1409_v17  ;;  %v365_v27 = vmul.f32 0.25, %v1401_v19  ;;  %v366_v28 = vmul.f32 0.25, %v1402_v20  ;;  %v1759_v16 = vld [vmem:[#allocation2 + $0x18] sm:$0xff] }
  0x17   : > { %v369_v21 = vpack.c.bf16 %v362_v14, %v361_v13  ;;  %v370_v24 = vpack.c.bf16 %v364_v18, %v363_v15  ;;  %v1587_v7 = vmov 0   ;;  %v1752_v14 = vld [vmem:[#allocation2 + $0x8] sm:$0xff]  ;;  %v1798_v33 = vld [vmem:[#allocation2 + $0x38] sm:$0xff] }
  0x18   : > { %v367_v29 = vmul.f32 0.25, %v1405_v22  ;;  %v368_v30 = vmul.f32 0.25, %v1406_v23  ;;  %v371_v31 = vpack.c.bf16 %v366_v28, %v365_v27  ;;  %1503 = vset.pattern.permute.xlu1 %v1587_v7  ;;  %1502 = vset.pattern.permute.xlu0 %v1587_v7  ;;  %v1772_v22 = vld [vmem:[#allocation2 + $0x20] sm:$0xff] }
  0x1a   : > { %1429 = vmatmul.mubr.msk.bf16.vlgmr.msra.gmra.mrb[0].mxu0 %vm329_vm0, %v369_v21  ;;  %1435 = vmatmul.mubr.msk.bf16.vlgmr.msra.gmra.mrb[0].mxu1 %vm329_vm0, %v370_v24  ;;  %v372_v32 = vpack.c.bf16 %v368_v30, %v367_v29  ;;  %v1788_v29 = vld [vmem:[#allocation2 + $0x30] sm:$0xff] }
  0x1b   : > { %1439 = vmatpush3.bf16.xpose.msra.mxu0 %v495_v25  ;;  %1445 = vmatpush3.bf16.xpose.msra.mxu1 %v547_v26  ;;  %v1783_v26 = vld [vmem:[#allocation2 + $0x28] sm:$0xff] }
  0x1c   : > { %1440 = vmatprep.mubr.msk.bf16.mxu0 %vm1585_vm1, %v1584_v0  ;;  %1446 = vmatprep.mubr.msk.bf16.mxu1 %vm1585_vm1, %v1584_v0 }
  0x1d   : > { %1450 = vmatprep.subr.bf16.mxu0 %v1584_v0  ;;  %1456 = vmatprep.subr.bf16.mxu1 %v1584_v0 }
  0x22   : > { %1441 = vmatmul.mubr.msk.bf16.vlgmr.msra.gmra.mrb[4].mxu0 %vm329_vm0, %v371_v31  ;;  %1447 = vmatmul.mubr.msk.bf16.vlgmr.msra.gmra.mrb[4].mxu1 %vm329_vm0, %v372_v32 }
  0x23   : > { %1452 = vmatprep.mubr.msk.bf16.mxu0 %vm1585_vm1, %v1584_v0  ;;  %1458 = vmatprep.mubr.msk.bf16.mxu1 %vm1585_vm1, %v1584_v0 }
  0xed   : > { %v427_v38 = vpop.f32.mrb[0].mxu0  ;;  %v479_v40 = vpop.f32.mrb[0].mxu1 }
  0xee   : > { %v1703_v39 = vsel %vm600_vm3, %v427_v38, -1e+30  ;;  %v1430_v41 = vpop.f32.mrb[1].mxu0  ;;  %v1706_v42 = vsel %vm600_vm3, %v479_v40, -1e+30  ;;  %v1436_v43 = vpop.f32.mrb[1].mxu1 }
  0xef   : > { %v430_v44 = vpop.f32.mrb[2].mxu0  ;;  %v622_v45 = vsel %vm329_vm0, %v1703_v39, -inf  ;;  %v482_v47 = vpop.f32.mrb[2].mxu1  ;;  %v628_v48 = vsel %vm329_vm0, %v1706_v42, -inf  ;;  %v1508_v41 = vld [vmem:[%s1823_s26] sm:$0xff]   ;;  %v1509_v43 = vld [vmem:[%s1823_s26 + $0x8] sm:$0xff]  }
  0xf0   : > { %v1711_v46 = vsel %vm601_vm4, %v430_v44, -1e+30  ;;  %623 = vmax.xlane.f32.xlu0 %v622_v45  ;;  %v1431_v49 = vpop.f32.mrb[3].mxu0  ;;  %v1716_v50 = vsel %vm601_vm4, %v482_v47, -1e+30  ;;  %629 = vmax.xlane.f32.xlu1 %v628_v48  ;;  %v1437_v51 = vpop.f32.mrb[3].mxu1 }
  0xf1   : > { %v625_v52 = vsel %vm329_vm0, %v1711_v46, -inf  ;;  %v631_v53 = vsel %vm329_vm0, %v1716_v50, -inf  ;;  %1451 = vmatpush3.bf16.msra.mxu0 %v1508_v41  ;;  %1457 = vmatpush3.bf16.msra.mxu1 %v1509_v43 }
  0xf2   : > { %1462 = vmatprep.subr.bf16.mxu0 %v1584_v0  ;;  %1468 = vmatprep.subr.bf16.mxu1 %v1584_v0 }
  0xf4   : > { %626 = vmax.xlane.f32.xlu0 %v625_v52  ;;  %632 = vmax.xlane.f32.xlu1 %v631_v53 }
  0xf5   : > { %v531_v54 = vpop.f32.mrb[4].mxu0  ;;  %v583_v57 = vpop.f32.mrb[4].mxu1 }
  0xf6   : > { %v1723_v55 = vsel %vm600_vm3, %v531_v54, -1e+30  ;;  %v1442_v56 = vpop.f32.mrb[5].mxu0  ;;  %v1726_v59 = vsel %vm600_vm3, %v583_v57, -1e+30  ;;  %v1448_v60 = vpop.f32.mrb[5].mxu1 }
  0xf7   : > { %v534_v58 = vpop.f32.mrb[6].mxu0  ;;  %v634_v61 = vsel %vm329_vm0, %v1723_v55, -inf  ;;  %v586_v1 = vpop.f32.mrb[6].mxu1  ;;  %v640_v5 = vsel %vm329_vm0, %v1726_v59, -inf }
  0xf8   : > { %v1731_v62 = vsel %vm601_vm4, %v534_v58, -1e+30  ;;  %v1443_v63 = vpop.f32.mrb[7].mxu0  ;;  %635 = vmax.xlane.f32.xlu0 %v634_v61  ;;  %v1734_v2 = vsel %vm601_vm4, %v586_v1, -1e+30  ;;  %v1449_v4 = vpop.f32.mrb[7].mxu1 }
  0xf9   : > { %v637_v3 = vsel %vm329_vm0, %v1731_v62, -inf  ;;  %v643_v6 = vsel %vm329_vm0, %v1734_v2, -inf }
  0xfa   : > { %638 = vmax.xlane.f32.xlu1 %v637_v3 }
  0xfc   : > { %641 = vmax.xlane.f32.xlu0 %v640_v5 }
  0xfe   : > { %644 = vmax.xlane.f32.xlu1 %v643_v6  ;;  %v1510_v6 = vld [vmem:[%s1823_s26 + $0x10] sm:$0xff]  }
 0x17d   : > { %v624_v10 = vpop.xlane.xlu0 %623  ;;  %v630_v11 = vpop.xlane.xlu1 %629 }
 0x17e   : > { %v1747_v12 = vmax.f32 %v1742_v8, %v624_v10  ;;  %v1750_v13 = vmax.f32 %v1744_v9, %v630_v11 }
 0x180   : > { %v654_v15 = vsub.f32 %v1742_v8, %v1747_v12  ;;  %1083 = vst.msk [vmem:[#allocation2] sm:$0xff] %vm312_vm2, %v1747_v12  ;;  %680 = vperm.xlu0 %1502, %v1747_v12   ;;  %v656_v17 = vsub.f32 %v1744_v9, %v1750_v13  ;;  %1085 = vst.msk [vmem:[#allocation2 + $0x10] sm:$0xff] %vm312_vm2, %v1750_v13  ;;  %690 = vperm.xlu1 %1503, %v1750_v13  }
 0x181   : > { %v627_v18 = vpop.xlane.xlu0 %626  ;;  %v633_v19 = vpop.xlane.xlu1 %632 }
 0x182   : > { %v1767_v20 = vmax.f32 %v1752_v14, %v627_v18  ;;  %v1770_v21 = vmax.f32 %v1759_v16, %v633_v19  ;;  %v666_v8 = vmul.f32 1.442695, %v656_v17 }
 0x184   : > { %v655_v23 = vsub.f32 %v1752_v14, %v1767_v20  ;;  %1084 = vst.msk [vmem:[#allocation2 + $0x8] sm:$0xff] %vm312_vm2, %v1767_v20  ;;  %v657_v24 = vsub.f32 %v1759_v16, %v1770_v21  ;;  %1086 = vst.msk [vmem:[#allocation2 + $0x18] sm:$0xff] %vm312_vm2, %v1770_v21  ;;  %685 = vperm.xlu1 %1503, %v1767_v20  }
 0x185   : > { %v636_v25 = vpop.xlane.xlu0 %635 }
 0x186   : > { %v1786_v27 = vmax.f32 %v1772_v22, %v636_v25 }
 0x187   : > { %v639_v28 = vpop.xlane.xlu1 %638 }
 0x188   : > { %v658_v30 = vsub.f32 %v1772_v22, %v1786_v27  ;;  %1087 = vst.msk [vmem:[#allocation2 + $0x20] sm:$0xff] %vm312_vm2, %v1786_v27  ;;  %v1795_v31 = vmax.f32 %v1783_v26, %v639_v28  ;;  %695 = vperm.xlu1 %1503, %v1770_v21  }
 0x189   : > { %v642_v32 = vpop.xlane.xlu0 %641 }
 0x18a   : > { %v659_v34 = vsub.f32 %v1783_v26, %v1795_v31  ;;  %1088 = vst.msk [vmem:[#allocation2 + $0x28] sm:$0xff] %vm312_vm2, %v1795_v31  ;;  %v1805_v35 = vmax.f32 %v1788_v29, %v642_v32  ;;  %v670_v14 = vmul.f32 1.442695, %v658_v30  ;;  %v742_v26 = vld [vmem:[#allocation3] sm:$0xff] }
 0x18b   : > { %v645_v36 = vpop.xlane.xlu1 %644 }
 0x18c   : > { %v660_v37 = vsub.f32 %v1788_v29, %v1805_v35  ;;  %1089 = vst.msk [vmem:[#allocation2 + $0x30] sm:$0xff] %vm312_vm2, %v1805_v35  ;;  %v1812_v38 = vmax.f32 %v1798_v33, %v645_v36  ;;  %700 = vperm.xlu1 %1503, %v1786_v27   ;;  %v672_v12 = vmul.f32 1.442695, %v659_v34  ;;  %v744_v27 = vld [vmem:[#allocation3 + $0x10] sm:$0xff] }
 0x18e   : > { %v661_v40 = vsub.f32 %v1798_v33, %v1812_v38  ;;  %1090 = vst.msk [vmem:[#allocation2 + $0x38] sm:$0xff] %vm312_vm2, %v1812_v38  ;;  %v674_v9 = vmul.f32 1.442695, %v660_v37 }
 0x190   : > { %710 = vperm.xlu1 %1503, %v1805_v35   ;;  %v743_v35 = vld [vmem:[#allocation3 + $0x8] sm:$0xff] }
 0x194   : > { %705 = vperm.xlu1 %1503, %v1795_v31  }
 0x198   : > { %715 = vperm.xlu1 %1503, %v1812_v38  }
 0x1ff   : > { %v681_v44 = vpop.permute.xlu0 %680  ;;  %v691_v47 = vpop.permute.xlu1 %690 }
 0x200   : > { %v718_v45 = vsub.f32 %v1703_v39, %v681_v44  ;;  %v720_v48 = vsub.f32 %v1706_v42, %v691_v47 }
 0x202   : > { %v726_v49 = vmul.f32 1.442695, %v718_v45  ;;  %v730_v51 = vmul.f32 1.442695, %v720_v48 }
 0x203   : > { %v686_v52 = vpop.permute.xlu1 %685 }
 0x204   : > { %1512 = vpow2.f32 %v726_v49  ;;  %v719_v53 = vsub.f32 %v1711_v46, %v686_v52 }
 0x205   : > { %1514 = vpow2.f32 %v730_v51 }
 0x206   : > { %v728_v54 = vmul.f32 1.442695, %v719_v53  ;;  %v664_v53 = vmul.f32 1.442695, %v655_v23 }
 0x207   : > { %v696_v56 = vpop.permute.xlu1 %695 }
 0x208   : > { %1516 = vpow2.f32 %v728_v54  ;;  %v721_v57 = vsub.f32 %v1716_v50, %v696_v56  ;;  %v668_v54 = vmul.f32 1.442695, %v657_v24  ;;  %v745_v56 = vld [vmem:[#allocation3 + $0x18] sm:$0xff] }
 0x20a   : > { %v732_v58 = vmul.f32 1.442695, %v721_v57 }
 0x20b   : > { %v701_v60 = vpop.permute.xlu1 %700 }
 0x20c   : > { %1518 = vpow2.f32 %v732_v58  ;;  %v722_v39 = vsub.f32 %v1723_v55, %v701_v60 }
 0x20e   : > { %v1513_v61 = vpop.eup %1512  ;;  %v734_v63 = vmul.f32 1.442695, %v722_v39  ;;  %v746_v39 = vld [vmem:[#allocation3 + $0x20] sm:$0xff] }
 0x20f   : > { %v1515_v42 = vpop.eup %1514  ;;  %v758_v1 = vsel %vm329_vm0, %v1513_v61, 0.0  ;;  %v711_v3 = vpop.permute.xlu1 %710 }
 0x210   : > { %759 = vadd.xlane.f32.xlu1 %v758_v1  ;;  %v764_v46 = vsel %vm329_vm0, %v1515_v42, 0.0  ;;  %1520 = vpow2.f32 %v734_v63  ;;  %v724_v4 = vsub.f32 %v1726_v59, %v711_v3  ;;  %v1511_v59 = vld [vmem:[%s1823_s26 + $0x18] sm:$0xff]  }
 0x211   : > { %765 = vadd.xlane.f32.xlu0 %v764_v46  ;;  %v748_v46 = vld [vmem:[#allocation3 + $0x30] sm:$0xff] }
 0x212   : > { %v1517_v50 = vpop.eup %1516  ;;  %v738_v5 = vmul.f32 1.442695, %v724_v4 }
 0x213   : > { %v706_v7 = vpop.permute.xlu1 %705  ;;  %v761_v55 = vsel %vm329_vm0, %v1517_v50, 0.0  ;;  %v855_v10 = vpack.c.bf16 %v1517_v50, %v1513_v61 }
 0x214   : > { %1522 = vpow2.f32 %v738_v5  ;;  %v723_v11 = vsub.f32 %v1731_v62, %v706_v7  ;;  %v747_v7 = vld [vmem:[#allocation3 + $0x28] sm:$0xff] }
 0x215   : > { %762 = vadd.xlane.f32.xlu0 %v761_v55  ;;  %1453 = vmatmul.mubr.msk.bf16.vlgmr.msra.gmra.mrb[8].mxu0 %vm329_vm0, %v855_v10 }
 0x216   : > { %v1519_v18 = vpop.eup %1518  ;;  %v736_v19 = vmul.f32 1.442695, %v723_v11  ;;  %1463 = vmatpush3.bf16.msra.mxu0 %v1510_v6  ;;  %1464 = vmatprep.mubr.msk.bf16.mxu0 %vm1585_vm1, %v1584_v0 }
 0x217   : > { %v716_v25 = vpop.permute.xlu1 %715  ;;  %v767_v28 = vsel %vm329_vm0, %v1519_v18, 0.0  ;;  %v856_v32 = vpack.c.bf16 %v1519_v18, %v1515_v42 }
 0x218   : > { %1524 = vpow2.f32 %v736_v19  ;;  %v725_v36 = vsub.f32 %v1734_v2, %v716_v25  ;;  %768 = vadd.xlane.f32.xlu1 %v767_v28 }
 0x219   : > { %1459 = vmatmul.mubr.msk.bf16.vlgmr.msra.gmra.mrb[8].mxu1 %vm329_vm0, %v856_v32 }
 0x21a   : > { %v1521_v62 = vpop.eup %1520  ;;  %v740_v41 = vmul.f32 1.442695, %v725_v36  ;;  %1469 = vmatpush3.bf16.msra.mxu1 %v1511_v59  ;;  %1470 = vmatprep.mubr.msk.bf16.mxu1 %vm1585_vm1, %v1584_v0  ;;  %v662_v0 = vmul.f32 1.442695, %v654_v15  ;;  %v676_v15 = vmul.f32 1.442695, %v661_v40 }
 0x21b   : > { %v770_v43 = vsel %vm329_vm0, %v1521_v62, 0.0  ;;  %v749_v59 = vld [vmem:[#allocation3 + $0x38] sm:$0xff] }
 0x21c   : > { %1526 = vpow2.f32 %v740_v41  ;;  %771 = vadd.xlane.f32.xlu0 %v770_v43 }
 0x21d   : > { %1528 = vpow2.f32 %v662_v0 }
 0x21e   : > { %v1523_v44 = vpop.eup %1522  ;;  %1530 = vpow2.f32 %v664_v53  ;;  %v799_v53 = vld [vmem:[#allocation4] sm:$0xff] }
 0x21f   : > { %v776_v45 = vsel %vm329_vm0, %v1523_v44, 0.0  ;;  %1532 = vpow2.f32 %v668_v54 }
 0x220   : > { %777 = vadd.xlane.f32.xlu0 %v776_v45  ;;  %1534 = vpow2.f32 %v666_v8  ;;  %v800_v8 = vld [vmem:[#allocation4 + $0x8] sm:$0xff] }
 0x221   : > { %1536 = vpow2.f32 %v672_v12 }
 0x222   : > { %v1525_v47 = vpop.eup %1524  ;;  %1538 = vpow2.f32 %v670_v14  ;;  %v801_v14 = vld [vmem:[#allocation4 + $0x10] sm:$0xff] }
 0x223   : > { %v773_v2 = vsel %vm329_vm0, %v1525_v47, 0.0  ;;  %v857_v48 = vpack.c.bf16 %v1525_v47, %v1521_v62  ;;  %1540 = vpow2.f32 %v676_v15 }
 0x224   : > { %774 = vadd.xlane.f32.xlu1 %v773_v2  ;;  %1542 = vpow2.f32 %v674_v9 }
 0x225   : > { %1465 = vmatmul.mubr.msk.bf16.vlgmr.msra.gmra.mrb[12].mxu0 %vm329_vm0, %v857_v48 }
 0x226   : > { %v1527_v49 = vpop.eup %1526 }
 0x227   : > { %v779_v51 = vsel %vm329_vm0, %v1527_v49, 0.0  ;;  %v858_v52 = vpack.c.bf16 %v1527_v49, %v1523_v44  ;;  %v1529_v16 = vpop.eup %1528 }
 0x228   : > { %780 = vadd.xlane.f32.xlu1 %v779_v51  ;;  %v1531_v13 = vpop.eup %1530  ;;  %v750_v29 = vmul.f32 %v1529_v16, %v742_v26 }
 0x229   : > { %1471 = vmatmul.mubr.msk.bf16.vlgmr.msra.gmra.mrb[12].mxu1 %vm329_vm0, %v858_v52  ;;  %v1533_v17 = vpop.eup %1532  ;;  %v751_v38 = vmul.f32 %v1531_v13, %v743_v35 }
 0x22a   : > { %v1535_v20 = vpop.eup %1534  ;;  %v753_v58 = vmul.f32 %v1533_v17, %v745_v56  ;;  %v804_v56 = vld [vmem:[#allocation4 + $0x28] sm:$0xff] }
 0x22b   : > { %v1537_v21 = vpop.eup %1536  ;;  %v752_v30 = vmul.f32 %v1535_v20, %v744_v27 }
 0x22c   : > { %v1539_v22 = vpop.eup %1538  ;;  %v755_v11 = vmul.f32 %v1537_v21, %v747_v7 }
 0x22d   : > { %v1541_v23 = vpop.eup %1540  ;;  %v754_v63 = vmul.f32 %v1539_v22, %v746_v39 }
 0x22e   : > { %v1543_v24 = vpop.eup %1542  ;;  %v757_v32 = vmul.f32 %v1541_v23, %v749_v59 }
 0x22f   : > { %v756_v5 = vmul.f32 %v1543_v24, %v748_v46 }
 0x236   : > { %809 = vperm.xlu0 %1502, %v1529_v16  }
 0x239   : > { %814 = vperm.xlu1 %1503, %v1531_v13  }
 0x23a   : > { %824 = vperm.xlu0 %1502, %v1533_v17  }
 0x23d   : > { %819 = vperm.xlu1 %1503, %v1535_v20   ;;  %v802_v20 = vld [vmem:[#allocation4 + $0x18] sm:$0xff] }
 0x23e   : > { %834 = vperm.xlu0 %1502, %v1537_v21  }
 0x241   : > { %829 = vperm.xlu1 %1503, %v1539_v22  }
 0x242   : > { %844 = vperm.xlu0 %1502, %v1541_v23  }
 0x245   : > { %839 = vperm.xlu1 %1503, %v1543_v24  }
 0x29d   : > { %v760_v31 = vpop.xlane.xlu1 %759 }
 0x29e   : > { %v766_v33 = vpop.xlane.xlu0 %765  ;;  %v782_v34 = vadd.f32 %v760_v31, %v750_v29 }
 0x29f   : > { %v784_v37 = vadd.f32 %v766_v33, %v752_v30 }
 0x2a0   : > { %791 = vst.msk [vmem:[#allocation3] sm:$0xff] %vm312_vm2, %v782_v34 }
 0x2a1   : > { %793 = vst.msk [vmem:[#allocation3 + $0x10] sm:$0xff] %vm312_vm2, %v784_v37 }
 0x2a2   : > { %v763_v40 = vpop.xlane.xlu0 %762 }
 0x2a3   : > { %v783_v57 = vadd.f32 %v763_v40, %v751_v38  ;;  %v803_v40 = vld [vmem:[#allocation4 + $0x20] sm:$0xff] }
 0x2a5   : > { %792 = vst.msk [vmem:[#allocation3 + $0x8] sm:$0xff] %vm312_vm2, %v783_v57  ;;  %v769_v60 = vpop.xlane.xlu1 %768 }
 0x2a6   : > { %v785_v61 = vadd.f32 %v769_v60, %v753_v58  ;;  %v805_v58 = vld [vmem:[#allocation4 + $0x30] sm:$0xff] }
 0x2a7   : > { %v1102_v42 = vld [vmem:[#allocation3] sm:$0xff] }
 0x2a8   : > { %1544 = vrcp.f32 %v1102_v42  ;;  %794 = vst.msk [vmem:[#allocation3 + $0x18] sm:$0xff] %vm312_vm2, %v785_v61  ;;  %v1104_v1 = vld [vmem:[#allocation3 + $0x10] sm:$0xff] }
 0x2a9   : > { %v772_v3 = vpop.xlane.xlu0 %771  ;;  %1546 = vrcp.f32 %v1104_v1  ;;  %v806_v1 = vld [vmem:[#allocation4 + $0x38] sm:$0xff] }
 0x2aa   : > { %v786_v4 = vadd.f32 %v772_v3, %v754_v63 }
 0x2ac   : > { %v1103_v50 = vld [vmem:[#allocation3 + $0x8] sm:$0xff]  ;;  %795 = vst.msk [vmem:[#allocation3 + $0x20] sm:$0xff] %vm312_vm2, %v786_v4 }
 0x2ad   : > { %1548 = vrcp.f32 %v1103_v50  ;;  %v778_v6 = vpop.xlane.xlu0 %777 }
 0x2ae   : > { %v788_v55 = vadd.f32 %v778_v6, %v756_v5 }
 0x2af   : > { %v1105_v10 = vld [vmem:[#allocation3 + $0x18] sm:$0xff] }
 0x2b0   : > { %797 = vst.msk [vmem:[#allocation3 + $0x30] sm:$0xff] %vm312_vm2, %v788_v55  ;;  %1550 = vrcp.f32 %v1105_v10 }
 0x2b1   : > { %v775_v19 = vpop.xlane.xlu1 %774 }
 0x2b2   : > { %v1545_v18 = vpop.eup %1544  ;;  %v787_v25 = vadd.f32 %v775_v19, %v755_v11 }
 0x2b3   : > { %1120 = vperm.xlu1 %1503, %v1545_v18   ;;  %v1106_v28 = vld [vmem:[#allocation3 + $0x20] sm:$0xff]  ;;  %v1547_v36 = vpop.eup %1546 }
 0x2b4   : > { %796 = vst.msk [vmem:[#allocation3 + $0x28] sm:$0xff] %vm312_vm2, %v787_v25  ;;  %1552 = vrcp.f32 %v1106_v28 }
 0x2b5   : > { %v781_v62 = vpop.xlane.xlu1 %780  ;;  %v810_v54 = vpop.permute.xlu0 %809 }
 0x2b6   : > { %v789_v43 = vadd.f32 %v781_v62, %v757_v32  ;;  %v847_v12 = vmul.f32 %v810_v54, %v799_v53 }
 0x2b7   : > { %v1549_v41 = vpop.eup %1548  ;;  %1130 = vperm.xlu1 %1503, %v1547_v36   ;;  %v1108_v44 = vld [vmem:[#allocation3 + $0x30] sm:$0xff] }
 0x2b8   : > { %1125 = vperm.xlu0 %1502, %v1549_v41   ;;  %798 = vst.msk [vmem:[#allocation3 + $0x38] sm:$0xff] %vm312_vm2, %v789_v43  ;;  %1554 = vrcp.f32 %v1108_v44 }
 0x2b9   : > { %v815_v52 = vpop.permute.xlu1 %814  ;;  %v825_v21 = vpop.permute.xlu0 %824 }
 0x2ba   : > { %v1551_v45 = vpop.eup %1550  ;;  %v848_v9 = vmul.f32 %v815_v52, %v800_v8  ;;  %v850_v29 = vmul.f32 %v825_v21, %v802_v20 }
 0x2bb   : > { %v1107_v47 = vld [vmem:[#allocation3 + $0x28] sm:$0xff] }
 0x2bc   : > { %1135 = vperm.xlu0 %1502, %v1551_v45   ;;  %1556 = vrcp.f32 %v1107_v47 }
 0x2bd   : > { %v820_v15 = vpop.permute.xlu1 %819  ;;  %v835_v38 = vpop.permute.xlu0 %834 }
 0x2be   : > { %v1553_v2 = vpop.eup %1552  ;;  %v849_v23 = vmul.f32 %v820_v15, %v801_v14  ;;  %v852_v61 = vmul.f32 %v835_v38, %v804_v56 }
 0x2bf   : > { %1140 = vperm.xlu1 %1503, %v1553_v2   ;;  %v1109_v48 = vld [vmem:[#allocation3 + $0x38] sm:$0xff] }
 0x2c0   : > { %1558 = vrcp.f32 %v1109_v48 }
 0x2c1   : > { %v830_v37 = vpop.permute.xlu1 %829  ;;  %v845_v3 = vpop.permute.xlu0 %844 }
 0x2c2   : > { %v1555_v49 = vpop.eup %1554  ;;  %v851_v57 = vmul.f32 %v830_v37, %v803_v40  ;;  %v854_v7 = vmul.f32 %v845_v3, %v806_v1 }
 0x2c3   : > { %1150 = vperm.xlu1 %1503, %v1555_v49  }
 0x2c5   : > { %v840_v60 = vpop.permute.xlu1 %839 }
 0x2c6   : > { %v1557_v0 = vpop.eup %1556  ;;  %v853_v4 = vmul.f32 %v840_v60, %v805_v58 }
 0x2c7   : > { %1145 = vperm.xlu0 %1502, %v1557_v0  }
 0x2ca   : > { %v1559_v51 = vpop.eup %1558 }
 0x2cb   : > { %1155 = vperm.xlu0 %1502, %v1559_v51  }
 0x2e8   : > { %v910_v16 = vpop.f32.mrb[8].mxu0 }
 0x2e9   : > { %v1067_v13 = vadd.f32 %v910_v16, %v847_v12  ;;  %v1454_v17 = vpop.f32.mrb[9].mxu0 }
 0x2ea   : > { %v913_v22 = vpop.f32.mrb[10].mxu0 }
 0x2eb   : > { %1075 = vst.msk [vmem:[#allocation4] sm:$0xff] %vm329_vm0, %v1067_v13  ;;  %v1068_v24 = vadd.f32 %v913_v22, %v848_v9  ;;  %v1455_v26 = vpop.f32.mrb[11].mxu0 }
 0x2ec   : > { %v960_v27 = vpop.f32.mrb[8].mxu1 }
 0x2ed   : > { %1076 = vst.msk [vmem:[#allocation4 + $0x8] sm:$0xff] %vm329_vm0, %v1068_v24  ;;  %v1069_v30 = vadd.f32 %v960_v27, %v849_v23  ;;  %v1460_v31 = vpop.f32.mrb[9].mxu1 }
 0x2ee   : > { %v963_v33 = vpop.f32.mrb[10].mxu1 }
 0x2ef   : > { %1077 = vst.msk [vmem:[#allocation4 + $0x10] sm:$0xff] %vm329_vm0, %v1069_v30  ;;  %v1070_v34 = vadd.f32 %v963_v33, %v850_v29  ;;  %v1461_v35 = vpop.f32.mrb[11].mxu1 }
 0x2f1   : > { %1078 = vst.msk [vmem:[#allocation4 + $0x18] sm:$0xff] %vm329_vm0, %v1070_v34 }
 0x2f2   : > { %v1094_v25 = vld [vmem:[#allocation4] sm:$0xff] }
 0x2f4   : > { %v1095_v43 = vld [vmem:[#allocation4 + $0x8] sm:$0xff] }
 0x2f6   : > { %v1096_v36 = vld [vmem:[#allocation4 + $0x10] sm:$0xff] }
 0x2f8   : > { %v1010_v39 = vpop.f32.mrb[12].mxu0  ;;  %v1097_v48 = vld [vmem:[#allocation4 + $0x18] sm:$0xff] }
 0x2f9   : > { %v1071_v42 = vadd.f32 %v1010_v39, %v851_v57  ;;  %v1466_v63 = vpop.f32.mrb[13].mxu0 }
 0x2fa   : > { %v1013_v46 = vpop.f32.mrb[14].mxu0 }
 0x2fb   : > { %1079 = vst.msk [vmem:[#allocation4 + $0x20] sm:$0xff] %vm329_vm0, %v1071_v42  ;;  %v1072_v50 = vadd.f32 %v1013_v46, %v852_v61  ;;  %v1467_v5 = vpop.f32.mrb[15].mxu0 }
 0x2fc   : > { %v1060_v6 = vpop.f32.mrb[12].mxu1 }
 0x2fd   : > { %1080 = vst.msk [vmem:[#allocation4 + $0x28] sm:$0xff] %vm329_vm0, %v1072_v50  ;;  %v1073_v55 = vadd.f32 %v1060_v6, %v853_v4  ;;  %v1472_v10 = vpop.f32.mrb[13].mxu1 }
 0x2fe   : > { %v1063_v11 = vpop.f32.mrb[14].mxu1 }
 0x2ff   : > { %1081 = vst.msk [vmem:[#allocation4 + $0x30] sm:$0xff] %vm329_vm0, %v1073_v55  ;;  %v1074_v18 = vadd.f32 %v1063_v11, %v854_v7  ;;  %v1473_v19 = vpop.f32.mrb[15].mxu1 }
 0x301   : > { %1082 = vst.msk [vmem:[#allocation4 + $0x38] sm:$0xff] %vm329_vm0, %v1074_v18 }
 0x302   : > { %v1098_v53 = vld [vmem:[#allocation4 + $0x20] sm:$0xff] }
 0x304   : > { %v1099_v13 = vld [vmem:[#allocation4 + $0x28] sm:$0xff] }
 0x306   : > { %v1100_v12 = vld [vmem:[#allocation4 + $0x30] sm:$0xff] }
 0x308   : > { %v1101_v21 = vld [vmem:[#allocation4 + $0x38] sm:$0xff] }
 0x332   : > { %v1121_v59 = vpop.permute.xlu1 %1120 }
 0x333   : > { %v1158_v28 = vmul.f32 %v1121_v59, %v1094_v25 }
 0x335   : > { %v1383_v32 = vpack.c.bf16 %v1158_v28, %v1158_v28 }
 0x336   : > { %v1131_v62 = vpop.permute.xlu1 %1130 }
 0x337   : > { %1199 = vst.msk [vmem:[%s1902_s29] sm:$0xf] %vm1198_vm5, %v1383_v32  ;;  %v1126_v41 = vpop.permute.xlu0 %1125  ;;  %v1160_v44 = vmul.f32 %v1131_v62, %v1096_v36 }
 0x338   : > { %v1159_v45 = vmul.f32 %v1126_v41, %v1095_v43 }
 0x339   : > { %v1385_v47 = vpack.c.bf16 %v1160_v44, %v1160_v44 }
 0x33a   : > { %v1384_v2 = vpack.c.bf16 %v1159_v45, %v1159_v45 }
 0x33b   : > { %1201 = vst.msk [vmem:[%s1902_s29 + $0x8] sm:$0xf] %vm1198_vm5, %v1385_v47  ;;  %v1136_v49 = vpop.permute.xlu0 %1135 }
 0x33c   : > { %1200 = vst.msk [vmem:[%s1902_s29 + $0x4] sm:$0xf] %vm1198_vm5, %v1384_v2  ;;  %v1161_v0 = vmul.f32 %v1136_v49, %v1097_v48 }
 0x33e   : > { %v1386_v51 = vpack.c.bf16 %v1161_v0, %v1161_v0  ;;  %v1141_v52 = vpop.permute.xlu1 %1140 }
 0x33f   : > { %v1162_v54 = vmul.f32 %v1141_v52, %v1098_v53 }
 0x340   : > { %1202 = vst.msk [vmem:[%s1902_s29 + $0xc] sm:$0xf] %vm1198_vm5, %v1386_v51 }
 0x341   : > { %v1387_v8 = vpack.c.bf16 %v1162_v54, %v1162_v54 }
 0x342   : > { %v1151_v14 = vpop.permute.xlu1 %1150 }
 0x343   : > { %1203 = vst.msk [vmem:[%s1902_s29 + $0x10] sm:$0xf] %vm1198_vm5, %v1387_v8  ;;  %v1164_v15 = vmul.f32 %v1151_v14, %v1100_v12 }
 0x345   : > { %v1389_v16 = vpack.c.bf16 %v1164_v15, %v1164_v15 }
 0x346   : > { %v1146_v9 = vpop.permute.xlu0 %1145 }
 0x347   : > { %1205 = vst.msk [vmem:[%s1902_s29 + $0x18] sm:$0xf] %vm1198_vm5, %v1389_v16  ;;  %v1163_v17 = vmul.f32 %v1146_v9, %v1099_v13 }
 0x349   : > { %v1388_v20 = vpack.c.bf16 %v1163_v17, %v1163_v17 }
 0x34a   : > { %v1156_v22 = vpop.permute.xlu0 %1155 }
 0x34b   : > { %1204 = vst.msk [vmem:[%s1902_s29 + $0x14] sm:$0xf] %vm1198_vm5, %v1388_v20  ;;  %v1165_v23 = vmul.f32 %v1156_v22, %v1101_v21 }
 0x34d   : > { %v1390_v24 = vpack.c.bf16 %v1165_v23, %v1165_v23 }
 0x34f   : > { %1206 = vst.msk [vmem:[%s1902_s29 + $0x1c] sm:$0xf] %vm1198_vm5, %v1390_v24 }
 0x350 PF: > { %s13_s14 = sadd.s32 1, %s1582_s14   ;;  %s1933_s12 = smov %s1578_s13 }
 0x351   : > { %p10_p5 = scmp.ge.s32.totalorder %s13_s14, 4   ;;  %s1934_s13 = smov %s1936_s15 }
 0x353   :  { %12 = sbr.rel (!%p10_p5) target bundleno = 2 (0x2), region = 80 }

</bundles_post_ra>
